<compile_context>
chip_gen: v7x
topology: tpu7x:2x2x1
jax: 0.10.0
libtpu: 0.0.40
codegen_flags: <defaults>
</compile_context>

<pallas_src>
import jax
import jax.numpy as jnp
from jax import lax
from jax.experimental import pallas as pl
from jax.experimental.pallas import tpu as pltpu

# ---------------- scaled-down ViT-B/16-in21k hyper-parameters ----------------
IMG = 32             # image size (224 in the real model)
PATCH = 16           # patch size (same as ViT-B/16)
IN_CHANS = 3
EMBED = 32           # embed dim (768 in the real model)
DEPTH = 2            # transformer depth (12 in the real model)
HEADS = 4            # attention heads (12 in the real model)
HEAD_DIM = EMBED // HEADS
MLP_HIDDEN = 4 * EMBED            # 128 -> lane-dense hidden activation
BACKBONE_CLASSES = 48             # stand-in for the 21843-way in21k head
NUM_CLASSES = 8                   # finetune classifier output
LN_EPS = 1e-6                     # timm ViT LayerNorm eps
NUM_PATCHES = (IMG // PATCH) * (IMG // PATCH)
NUM_TOKENS = NUM_PATCHES + 1      # patches + cls token
PATCH_FEATS = IN_CHANS * PATCH * PATCH  # 768 (multiple of 128)


# ------------------------------ in-kernel math --------------------------------
def _gelu_tanh(x):
    # tanh-approx GELU: transcendental runs on the EUP slot (perf review).
    c0 = jnp.float32(0.7978845608028654)   # sqrt(2/pi)
    c1 = jnp.float32(0.044715)
    return 0.5 * x * (1.0 + jnp.tanh(c0 * (x + c1 * x * x * x)))


def _layernorm(x, g, b):
    mu = jnp.mean(x, axis=-1, keepdims=True)
    xc = x - mu
    var = jnp.mean(xc * xc, axis=-1, keepdims=True)
    return xc * lax.rsqrt(var + jnp.float32(LN_EPS)) * g + b


# ------------------------------ fused ViT kernel ------------------------------
def _vit_kernel(patches_ref, patch_w_ref, patch_b_ref, cls_ref, pos_ref,
                ln1_g_ref, ln1_b_ref, qkv_w_ref, qkv_b_ref,
                proj_w_ref, proj_b_ref,
                ln2_g_ref, ln2_b_ref, fc1_w_ref, fc1_b_ref,
                fc2_w_ref, fc2_b_ref,
                norm_g_ref, norm_b_ref, head_w_ref, head_b_ref,
                clsf_w_ref, clsf_b_ref, out_ref):
    f32 = jnp.float32
    # ---- patch embedding: conv(stride=kernel=PATCH) == per-patch matmul ----
    patches = patches_ref[0].astype(f32)                         # (T, 768), row 0 is a dummy cls slot
    pe = jnp.dot(patches, patch_w_ref[...].astype(f32),
                 preferred_element_type=f32) + patch_b_ref[...].astype(f32)   # (T, D)
    row_ids = lax.broadcasted_iota(jnp.int32, (NUM_TOKENS, EMBED), 0)
    tok = jnp.where(row_ids == 0, cls_ref[...].astype(f32), pe)  # put cls token in row 0
    h = tok + pos_ref[...].astype(f32)                           # (T, D)

    scale = 1.0 / float(HEAD_DIM) ** 0.5
    for d in range(DEPTH):
        # -------- attention branch: h = h + proj(MHSA(LN1(h))) --------
        y = _layernorm(h, ln1_g_ref[d].astype(f32), ln1_b_ref[d].astype(f32))
        qkv = jnp.dot(y, qkv_w_ref[d].astype(f32),
                      preferred_element_type=f32) + qkv_b_ref[d].astype(f32)  # (T, 3D)
        proj_w = proj_w_ref[d].astype(f32)                       # (D, D)
        attn = jnp.zeros((NUM_TOKENS, EMBED), f32)
        for hd in range(HEADS):
            c = hd * HEAD_DIM
            q = qkv[:, c:c + HEAD_DIM]                           # (T, Dh)
            k = qkv[:, EMBED + c:EMBED + c + HEAD_DIM]
            v = qkv[:, 2 * EMBED + c:2 * EMBED + c + HEAD_DIM]
            s = lax.dot_general(q, k, (((1,), (1,)), ((), ())),
                                preferred_element_type=f32) * scale           # (T, T)
            s = s - jnp.max(s, axis=-1, keepdims=True)
            p = jnp.exp(s)
            p = p * pl.reciprocal(jnp.sum(p, axis=-1, keepdims=True), approx=True)
            o = jnp.dot(p, v, preferred_element_type=f32)        # (T, Dh)
            # fold the output projection per head: concat_h(o_h) @ W == sum_h o_h @ W[h]
            attn = attn + jnp.dot(o, proj_w[c:c + HEAD_DIM, :],
                                  preferred_element_type=f32)
        h = h + attn + proj_b_ref[d].astype(f32)                 # fused residual + proj bias

        # -------- MLP branch: h = h + fc2(GELU(fc1(LN2(h)))) --------
        y = _layernorm(h, ln2_g_ref[d].astype(f32), ln2_b_ref[d].astype(f32))
        mid = _gelu_tanh(jnp.dot(y, fc1_w_ref[d].astype(f32),
                                 preferred_element_type=f32)
                         + fc1_b_ref[d].astype(f32))             # (T, MLP_HIDDEN)
        h = h + jnp.dot(mid, fc2_w_ref[d].astype(f32),
                        preferred_element_type=f32) + fc2_b_ref[d].astype(f32)

    # -------- final norm, cls token, backbone head, finetune classifier --------
    hn = _layernorm(h, norm_g_ref[...].astype(f32), norm_b_ref[...].astype(f32))
    cls_tok = hn[0:1, :]                                          # (1, D)
    feats = jnp.dot(cls_tok, head_w_ref[...].astype(f32),
                    preferred_element_type=f32) + head_b_ref[...].astype(f32)  # (1, 48)
    logits = jnp.dot(feats, clsf_w_ref[...].astype(f32),
                     preferred_element_type=f32) + clsf_b_ref[...].astype(f32)  # (1, 8)
    out_ref[0] = logits.astype(out_ref.dtype)


# ----------------------------- parameter init --------------------------------
def init_params(key):
    def nrm(k, shape, std=0.02):
        return (std * jax.random.normal(k, shape)).astype(jnp.float32)

    keys = iter(jax.random.split(key, 8 + 8 * DEPTH))
    # nn.Conv2d(IN_CHANS, EMBED, PATCH, stride=PATCH) weight, flattened once at
    # init into the (C*PATCH*PATCH, EMBED) matmul layout (hoisted out of forward).
    conv_w = nrm(next(keys), (EMBED, IN_CHANS, PATCH, PATCH))
    p = {
        "patch_w": conv_w.reshape(EMBED, PATCH_FEATS).T,          # (768, D)
        "patch_b": nrm(next(keys), (1, EMBED)),
        "cls_token": nrm(next(keys), (1, EMBED)),
        "pos_embed": nrm(next(keys), (NUM_TOKENS, EMBED)),
        "norm_g": jnp.ones((1, EMBED), jnp.float32),
        "norm_b": jnp.zeros((1, EMBED), jnp.float32),
        "head_w": nrm(next(keys), (EMBED, BACKBONE_CLASSES)),
        "head_b": nrm(next(keys), (1, BACKBONE_CLASSES)),
        "cls_w": nrm(next(keys), (BACKBONE_CLASSES, NUM_CLASSES)),
        "cls_b": nrm(next(keys), (1, NUM_CLASSES)),
    }
    qkv_w, qkv_b, proj_w, proj_b = [], [], [], []
    fc1_w, fc1_b, fc2_w, fc2_b = [], [], [], []
    for _ in range(DEPTH):
        qkv_w.append(nrm(next(keys), (EMBED, 3 * EMBED)))
        qkv_b.append(nrm(next(keys), (1, 3 * EMBED)))
        proj_w.append(nrm(next(keys), (EMBED, EMBED)))
        proj_b.append(nrm(next(keys), (1, EMBED)))
        fc1_w.append(nrm(next(keys), (EMBED, MLP_HIDDEN)))
        fc1_b.append(nrm(next(keys), (1, MLP_HIDDEN)))
        fc2_w.append(nrm(next(keys), (MLP_HIDDEN, EMBED)))
        fc2_b.append(nrm(next(keys), (1, EMBED)))
    # per-block weights stacked along a leading DEPTH axis -> one pallas_call
    p.update(
        ln1_g=jnp.ones((DEPTH, 1, EMBED), jnp.float32),
        ln1_b=jnp.zeros((DEPTH, 1, EMBED), jnp.float32),
        ln2_g=jnp.ones((DEPTH, 1, EMBED), jnp.float32),
        ln2_b=jnp.zeros((DEPTH, 1, EMBED), jnp.float32),
        qkv_w=jnp.stack(qkv_w), qkv_b=jnp.stack(qkv_b),
        proj_w=jnp.stack(proj_w), proj_b=jnp.stack(proj_b),
        fc1_w=jnp.stack(fc1_w), fc1_b=jnp.stack(fc1_b),
        fc2_w=jnp.stack(fc2_w), fc2_b=jnp.stack(fc2_b),
    )
    return p


# ------------------------------- forward pass ---------------------------------
_WEIGHT_ORDER = ("patch_w", "patch_b", "cls_token", "pos_embed",
                 "ln1_g", "ln1_b", "qkv_w", "qkv_b", "proj_w", "proj_b",
                 "ln2_g", "ln2_b", "fc1_w", "fc1_b", "fc2_w", "fc2_b",
                 "norm_g", "norm_b", "head_w", "head_b", "cls_w", "cls_b")


def vit_finetune_forward(params, x):
    """x: (B, C, H, W) float32, NCHW (PyTorch convention)."""
    B, C, H, W = x.shape
    nh, nw = H // PATCH, W // PATCH
    # im2col glue for the patch-embed conv (stride=kernel=PATCH): per patch the
    # features are ordered (c, ph, pw), matching the conv-weight flatten.
    patches = (x.reshape(B, C, nh, PATCH, nw, PATCH)
                .transpose(0, 2, 4, 1, 3, 5)
                .reshape(B, nh * nw, PATCH_FEATS))
    # prepend a dummy row for the cls-token slot so the kernel never concatenates
    patches = jnp.concatenate(
        [jnp.zeros((B, 1, PATCH_FEATS), patches.dtype), patches], axis=1)  # (B, T, 768)

    weights = [params[k] for k in _WEIGHT_ORDER]

    def whole(a):
        return pl.BlockSpec(a.shape, lambda b, n=a.ndim: (0,) * n)

    in_specs = [pl.BlockSpec((1, NUM_TOKENS, PATCH_FEATS), lambda b: (b, 0, 0))]
    in_specs += [whole(w) for w in weights]

    out = pl.pallas_call(
        _vit_kernel,
        grid=(B,),
        out_shape=jax.ShapeDtypeStruct((B, 1, NUM_CLASSES), x.dtype),
        in_specs=in_specs,
        out_specs=pl.BlockSpec((1, 1, NUM_CLASSES), lambda b: (b, 0, 0)),
        compiler_params=pltpu.CompilerParams(
            dimension_semantics=("parallel",)),   # batch shards across TCs (v7x)
    )(patches, *weights)
    return out.reshape(B, NUM_CLASSES)


# ----------------------------------- main --------------------------------------
if __name__ == "__main__":
    key = jax.random.PRNGKey(0)
    k_x, k_p = jax.random.split(key)
    x = jax.random.normal(k_x, (2, IN_CHANS, IMG, IMG), dtype=jnp.float32)
    params = init_params(k_p)

    fwd = jax.jit(vit_finetune_forward)
    out = fwd(params, x)
    jax.block_until_ready(out)
    assert out.shape == (2, NUM_CLASSES) and out.dtype == jnp.float32
    print("KERNEL_OK")
</pallas_src>

<mosaic_0001>
module attributes {stable_mosaic.version = 11 : i64} {
  func.func @_vit_kernel(%arg0: i32, %arg1: memref<1x5x768xf32, #tpu.memory_space<vmem>>, %arg2: memref<768x32xf32, #tpu.memory_space<vmem>>, %arg3: memref<1x32xf32, #tpu.memory_space<vmem>>, %arg4: memref<1x32xf32, #tpu.memory_space<vmem>>, %arg5: memref<5x32xf32, #tpu.memory_space<vmem>>, %arg6: memref<2x1x32xf32, #tpu.memory_space<vmem>>, %arg7: memref<2x1x32xf32, #tpu.memory_space<vmem>>, %arg8: memref<2x32x96xf32, #tpu.memory_space<vmem>>, %arg9: memref<2x1x96xf32, #tpu.memory_space<vmem>>, %arg10: memref<2x32x32xf32, #tpu.memory_space<vmem>>, %arg11: memref<2x1x32xf32, #tpu.memory_space<vmem>>, %arg12: memref<2x1x32xf32, #tpu.memory_space<vmem>>, %arg13: memref<2x1x32xf32, #tpu.memory_space<vmem>>, %arg14: memref<2x32x128xf32, #tpu.memory_space<vmem>>, %arg15: memref<2x1x128xf32, #tpu.memory_space<vmem>>, %arg16: memref<2x128x32xf32, #tpu.memory_space<vmem>>, %arg17: memref<2x1x32xf32, #tpu.memory_space<vmem>>, %arg18: memref<1x32xf32, #tpu.memory_space<vmem>>, %arg19: memref<1x32xf32, #tpu.memory_space<vmem>>, %arg20: memref<32x48xf32, #tpu.memory_space<vmem>>, %arg21: memref<1x48xf32, #tpu.memory_space<vmem>>, %arg22: memref<48x8xf32, #tpu.memory_space<vmem>>, %arg23: memref<1x8xf32, #tpu.memory_space<vmem>>, %arg24: memref<1x1x8xf32, #tpu.memory_space<vmem>>) attributes {dimension_semantics = [#tpu.dimension_semantics<parallel>], iteration_bounds = array<i64: 2>, scalar_prefetch = 0 : i64, scratch_operands = 0 : i64, tpu.core_type = #tpu.core_type<tc>, window_params = [{transform_indices = @transform_0, window_bounds = array<i64: 1, 5, 768>}, {pipeline_mode = #tpu.pipeline_mode<synchronous>, transform_indices = @transform_1, window_bounds = array<i64: 768, 32>}, {pipeline_mode = #tpu.pipeline_mode<synchronous>, transform_indices = @transform_2, window_bounds = array<i64: 1, 32>}, {pipeline_mode = #tpu.pipeline_mode<synchronous>, transform_indices = @transform_3, window_bounds = array<i64: 1, 32>}, {pipeline_mode = #tpu.pipeline_mode<synchronous>, transform_indices = @transform_4, window_bounds = array<i64: 5, 32>}, {pipeline_mode = #tpu.pipeline_mode<synchronous>, transform_indices = @transform_5, window_bounds = array<i64: 2, 1, 32>}, {pipeline_mode = #tpu.pipeline_mode<synchronous>, transform_indices = @transform_6, window_bounds = array<i64: 2, 1, 32>}, {pipeline_mode = #tpu.pipeline_mode<synchronous>, transform_indices = @transform_7, window_bounds = array<i64: 2, 32, 96>}, {pipeline_mode = #tpu.pipeline_mode<synchronous>, transform_indices = @transform_8, window_bounds = array<i64: 2, 1, 96>}, {pipeline_mode = #tpu.pipeline_mode<synchronous>, transform_indices = @transform_9, window_bounds = array<i64: 2, 32, 32>}, {pipeline_mode = #tpu.pipeline_mode<synchronous>, transform_indices = @transform_10, window_bounds = array<i64: 2, 1, 32>}, {pipeline_mode = #tpu.pipeline_mode<synchronous>, transform_indices = @transform_11, window_bounds = array<i64: 2, 1, 32>}, {pipeline_mode = #tpu.pipeline_mode<synchronous>, transform_indices = @transform_12, window_bounds = array<i64: 2, 1, 32>}, {pipeline_mode = #tpu.pipeline_mode<synchronous>, transform_indices = @transform_13, window_bounds = array<i64: 2, 32, 128>}, {pipeline_mode = #tpu.pipeline_mode<synchronous>, transform_indices = @transform_14, window_bounds = array<i64: 2, 1, 128>}, {pipeline_mode = #tpu.pipeline_mode<synchronous>, transform_indices = @transform_15, window_bounds = array<i64: 2, 128, 32>}, {pipeline_mode = #tpu.pipeline_mode<synchronous>, transform_indices = @transform_16, window_bounds = array<i64: 2, 1, 32>}, {pipeline_mode = #tpu.pipeline_mode<synchronous>, transform_indices = @transform_17, window_bounds = array<i64: 1, 32>}, {pipeline_mode = #tpu.pipeline_mode<synchronous>, transform_indices = @transform_18, window_bounds = array<i64: 1, 32>}, {pipeline_mode = #tpu.pipeline_mode<synchronous>, transform_indices = @transform_19, window_bounds = array<i64: 32, 48>}, {pipeline_mode = #tpu.pipeline_mode<synchronous>, transform_indices = @transform_20, window_bounds = array<i64: 1, 48>}, {pipeline_mode = #tpu.pipeline_mode<synchronous>, transform_indices = @transform_21, window_bounds = array<i64: 48, 8>}, {pipeline_mode = #tpu.pipeline_mode<synchronous>, transform_indices = @transform_22, window_bounds = array<i64: 1, 8>}, {transform_indices = @transform_23, window_bounds = array<i64: 1, 1, 8>}]} {
    %c0 = arith.constant 0 : index
    %c0_0 = arith.constant 0 : index
    %c0_1 = arith.constant 0 : index
    %0 = vector.load %arg1[%c0, %c0_0, %c0_1] : memref<1x5x768xf32, #tpu.memory_space<vmem>>, vector<1x5x768xf32>
    %1 = vector.shape_cast %0 : vector<1x5x768xf32> to vector<5x768xf32>
    %c0_2 = arith.constant 0 : index
    %c0_3 = arith.constant 0 : index
    %2 = vector.load %arg2[%c0_2, %c0_3] : memref<768x32xf32, #tpu.memory_space<vmem>>, vector<768x32xf32>
    %cst = arith.constant dense<0.000000e+00> : vector<5x32xf32>
    %3 = tpu.matmul %1, %2, %cst {dimension_numbers = #tpu.dot_dimension_numbers<[1], [0], [0], [1], [0, 0, 1, 1], [], []>} : vector<5x768xf32>, vector<768x32xf32>, vector<5x32xf32> -> vector<5x32xf32>
    %c0_4 = arith.constant 0 : index
    %c0_5 = arith.constant 0 : index
    %4 = vector.load %arg3[%c0_4, %c0_5] : memref<1x32xf32, #tpu.memory_space<vmem>>, vector<1x32xf32>
    %5 = vector.broadcast %4 : vector<1x32xf32> to vector<5x32xf32>
    %6 = arith.addf %3, %5 : vector<5x32xf32>
    %7 = tpu.iota {dimensions = array<i32: 0>} : vector<5x32xi32>
    %c0_i32 = arith.constant 0 : i32
    %8 = vector.broadcast %c0_i32 : i32 to vector<5x32xi32>
    %9 = arith.cmpi eq, %7, %8 : vector<5x32xi32>
    %c0_6 = arith.constant 0 : index
    %c0_7 = arith.constant 0 : index
    %10 = vector.load %arg4[%c0_6, %c0_7] : memref<1x32xf32, #tpu.memory_space<vmem>>, vector<1x32xf32>
    %11 = vector.shape_cast %10 : vector<1x32xf32> to vector<1x32xf32>
    %12 = vector.broadcast %11 : vector<1x32xf32> to vector<5x32xf32>
    %13 = arith.select %9, %12, %6 : vector<5x32xi1>, vector<5x32xf32>
    %c0_8 = arith.constant 0 : index
    %c0_9 = arith.constant 0 : index
    %14 = vector.load %arg5[%c0_8, %c0_9] : memref<5x32xf32, #tpu.memory_space<vmem>>, vector<5x32xf32>
    %15 = arith.addf %13, %14 : vector<5x32xf32>
    %c0_10 = arith.constant 0 : index
    %c0_11 = arith.constant 0 : index
    %c0_12 = arith.constant 0 : index
    %16 = vector.load %arg6[%c0_10, %c0_11, %c0_12] : memref<2x1x32xf32, #tpu.memory_space<vmem>>, vector<1x1x32xf32>
    %17 = vector.shape_cast %16 : vector<1x1x32xf32> to vector<1x32xf32>
    %c0_13 = arith.constant 0 : index
    %c0_14 = arith.constant 0 : index
    %c0_15 = arith.constant 0 : index
    %18 = vector.load %arg7[%c0_13, %c0_14, %c0_15] : memref<2x1x32xf32, #tpu.memory_space<vmem>>, vector<1x1x32xf32>
    %19 = vector.shape_cast %18 : vector<1x1x32xf32> to vector<1x32xf32>
    %cst_16 = arith.constant dense<0.000000e+00> : vector<5xf32>
    %20 = vector.multi_reduction <add>, %15, %cst_16 [1] : vector<5x32xf32> to vector<5xf32>
    %21 = vector.shape_cast %20 : vector<5xf32> to vector<5x1xf32>
    %cst_17 = arith.constant 3.200000e+01 : f32
    %22 = vector.broadcast %cst_17 : f32 to vector<5x1xf32>
    %23 = arith.divf %21, %22 : vector<5x1xf32>
    %24 = vector.broadcast %23 : vector<5x1xf32> to vector<5x32xf32>
    %25 = arith.subf %15, %24 : vector<5x32xf32>
    %26 = arith.mulf %25, %25 : vector<5x32xf32>
    %cst_18 = arith.constant dense<0.000000e+00> : vector<5xf32>
    %27 = vector.multi_reduction <add>, %26, %cst_18 [1] : vector<5x32xf32> to vector<5xf32>
    %28 = vector.shape_cast %27 : vector<5xf32> to vector<5x1xf32>
    %cst_19 = arith.constant 3.200000e+01 : f32
    %29 = vector.broadcast %cst_19 : f32 to vector<5x1xf32>
    %30 = arith.divf %28, %29 : vector<5x1xf32>
    %cst_20 = arith.constant 9.99999997E-7 : f32
    %31 = vector.broadcast %cst_20 : f32 to vector<5x1xf32>
    %32 = arith.addf %30, %31 : vector<5x1xf32>
    %33 = math.rsqrt %32 : vector<5x1xf32>
    %34 = vector.broadcast %33 : vector<5x1xf32> to vector<5x32xf32>
    %35 = arith.mulf %25, %34 : vector<5x32xf32>
    %36 = vector.broadcast %17 : vector<1x32xf32> to vector<5x32xf32>
    %37 = arith.mulf %35, %36 : vector<5x32xf32>
    %38 = vector.broadcast %19 : vector<1x32xf32> to vector<5x32xf32>
    %39 = arith.addf %37, %38 : vector<5x32xf32>
    %c0_21 = arith.constant 0 : index
    %c0_22 = arith.constant 0 : index
    %c0_23 = arith.constant 0 : index
    %40 = vector.load %arg8[%c0_21, %c0_22, %c0_23] : memref<2x32x96xf32, #tpu.memory_space<vmem>>, vector<1x32x96xf32>
    %41 = vector.shape_cast %40 : vector<1x32x96xf32> to vector<32x96xf32>
    %cst_24 = arith.constant dense<0.000000e+00> : vector<5x96xf32>
    %42 = tpu.matmul %39, %41, %cst_24 {dimension_numbers = #tpu.dot_dimension_numbers<[1], [0], [0], [1], [0, 0, 1, 1], [], []>} : vector<5x32xf32>, vector<32x96xf32>, vector<5x96xf32> -> vector<5x96xf32>
    %c0_25 = arith.constant 0 : index
    %c0_26 = arith.constant 0 : index
    %c0_27 = arith.constant 0 : index
    %43 = vector.load %arg9[%c0_25, %c0_26, %c0_27] : memref<2x1x96xf32, #tpu.memory_space<vmem>>, vector<1x1x96xf32>
    %44 = vector.shape_cast %43 : vector<1x1x96xf32> to vector<1x96xf32>
    %45 = vector.broadcast %44 : vector<1x96xf32> to vector<5x96xf32>
    %46 = arith.addf %42, %45 : vector<5x96xf32>
    %c0_28 = arith.constant 0 : index
    %c0_29 = arith.constant 0 : index
    %c0_30 = arith.constant 0 : index
    %47 = vector.load %arg10[%c0_28, %c0_29, %c0_30] : memref<2x32x32xf32, #tpu.memory_space<vmem>>, vector<1x32x32xf32>
    %48 = vector.shape_cast %47 : vector<1x32x32xf32> to vector<32x32xf32>
    %cst_31 = arith.constant 0.000000e+00 : f32
    %49 = vector.broadcast %cst_31 : f32 to vector<5x32xf32>
    %50 = vector.extract_strided_slice %46 {offsets = [0, 0], sizes = [5, 8], strides = [1, 1]} : vector<5x96xf32> to vector<5x8xf32>
    %51 = vector.extract_strided_slice %46 {offsets = [0, 32], sizes = [5, 8], strides = [1, 1]} : vector<5x96xf32> to vector<5x8xf32>
    %52 = vector.extract_strided_slice %46 {offsets = [0, 64], sizes = [5, 8], strides = [1, 1]} : vector<5x96xf32> to vector<5x8xf32>
    %cst_32 = arith.constant dense<0.000000e+00> : vector<5x5xf32>
    %53 = tpu.matmul %50, %51, %cst_32 {dimension_numbers = #tpu.dot_dimension_numbers<[1], [1], [0], [0], [0, 0, 1, 0], [], []>} : vector<5x8xf32>, vector<5x8xf32>, vector<5x5xf32> -> vector<5x5xf32>
    %cst_33 = arith.constant 0.353553385 : f32
    %54 = vector.broadcast %cst_33 : f32 to vector<5x5xf32>
    %55 = arith.mulf %53, %54 : vector<5x5xf32>
    %cst_34 = arith.constant dense<0xFF800000> : vector<5xf32>
    %56 = vector.multi_reduction <maximumf>, %55, %cst_34 [1] : vector<5x5xf32> to vector<5xf32>
    %57 = vector.shape_cast %56 : vector<5xf32> to vector<5x1xf32>
    %58 = vector.broadcast %57 : vector<5x1xf32> to vector<5x5xf32>
    %59 = arith.subf %55, %58 : vector<5x5xf32>
    %60 = math.exp %59 : vector<5x5xf32>
    %cst_35 = arith.constant dense<0.000000e+00> : vector<5xf32>
    %61 = vector.multi_reduction <add>, %60, %cst_35 [1] : vector<5x5xf32> to vector<5xf32>
    %62 = vector.shape_cast %61 : vector<5xf32> to vector<5x1xf32>
    %63 = tpu.reciprocal %62 {approx = true} : vector<5x1xf32> -> vector<5x1xf32>
    %64 = vector.broadcast %63 : vector<5x1xf32> to vector<5x5xf32>
    %65 = arith.mulf %60, %64 : vector<5x5xf32>
    %cst_36 = arith.constant dense<0.000000e+00> : vector<5x8xf32>
    %66 = tpu.matmul %65, %52, %cst_36 {dimension_numbers = #tpu.dot_dimension_numbers<[1], [0], [0], [1], [0, 0, 1, 1], [], []>} : vector<5x5xf32>, vector<5x8xf32>, vector<5x8xf32> -> vector<5x8xf32>
    %67 = vector.extract_strided_slice %48 {offsets = [0, 0], sizes = [8, 32], strides = [1, 1]} : vector<32x32xf32> to vector<8x32xf32>
    %cst_37 = arith.constant dense<0.000000e+00> : vector<5x32xf32>
    %68 = tpu.matmul %66, %67, %cst_37 {dimension_numbers = #tpu.dot_dimension_numbers<[1], [0], [0], [1], [0, 0, 1, 1], [], []>} : vector<5x8xf32>, vector<8x32xf32>, vector<5x32xf32> -> vector<5x32xf32>
    %69 = arith.addf %49, %68 : vector<5x32xf32>
    %70 = vector.extract_strided_slice %46 {offsets = [0, 8], sizes = [5, 8], strides = [1, 1]} : vector<5x96xf32> to vector<5x8xf32>
    %71 = vector.extract_strided_slice %46 {offsets = [0, 40], sizes = [5, 8], strides = [1, 1]} : vector<5x96xf32> to vector<5x8xf32>
    %72 = vector.extract_strided_slice %46 {offsets = [0, 72], sizes = [5, 8], strides = [1, 1]} : vector<5x96xf32> to vector<5x8xf32>
    %cst_38 = arith.constant dense<0.000000e+00> : vector<5x5xf32>
    %73 = tpu.matmul %70, %71, %cst_38 {dimension_numbers = #tpu.dot_dimension_numbers<[1], [1], [0], [0], [0, 0, 1, 0], [], []>} : vector<5x8xf32>, vector<5x8xf32>, vector<5x5xf32> -> vector<5x5xf32>
    %cst_39 = arith.constant 0.353553385 : f32
    %74 = vector.broadcast %cst_39 : f32 to vector<5x5xf32>
    %75 = arith.mulf %73, %74 : vector<5x5xf32>
    %cst_40 = arith.constant dense<0xFF800000> : vector<5xf32>
    %76 = vector.multi_reduction <maximumf>, %75, %cst_40 [1] : vector<5x5xf32> to vector<5xf32>
    %77 = vector.shape_cast %76 : vector<5xf32> to vector<5x1xf32>
    %78 = vector.broadcast %77 : vector<5x1xf32> to vector<5x5xf32>
    %79 = arith.subf %75, %78 : vector<5x5xf32>
    %80 = math.exp %79 : vector<5x5xf32>
    %cst_41 = arith.constant dense<0.000000e+00> : vector<5xf32>
    %81 = vector.multi_reduction <add>, %80, %cst_41 [1] : vector<5x5xf32> to vector<5xf32>
    %82 = vector.shape_cast %81 : vector<5xf32> to vector<5x1xf32>
    %83 = tpu.reciprocal %82 {approx = true} : vector<5x1xf32> -> vector<5x1xf32>
    %84 = vector.broadcast %83 : vector<5x1xf32> to vector<5x5xf32>
    %85 = arith.mulf %80, %84 : vector<5x5xf32>
    %cst_42 = arith.constant dense<0.000000e+00> : vector<5x8xf32>
    %86 = tpu.matmul %85, %72, %cst_42 {dimension_numbers = #tpu.dot_dimension_numbers<[1], [0], [0], [1], [0, 0, 1, 1], [], []>} : vector<5x5xf32>, vector<5x8xf32>, vector<5x8xf32> -> vector<5x8xf32>
    %87 = vector.extract_strided_slice %48 {offsets = [8, 0], sizes = [8, 32], strides = [1, 1]} : vector<32x32xf32> to vector<8x32xf32>
    %cst_43 = arith.constant dense<0.000000e+00> : vector<5x32xf32>
    %88 = tpu.matmul %86, %87, %cst_43 {dimension_numbers = #tpu.dot_dimension_numbers<[1], [0], [0], [1], [0, 0, 1, 1], [], []>} : vector<5x8xf32>, vector<8x32xf32>, vector<5x32xf32> -> vector<5x32xf32>
    %89 = arith.addf %69, %88 : vector<5x32xf32>
    %90 = vector.extract_strided_slice %46 {offsets = [0, 16], sizes = [5, 8], strides = [1, 1]} : vector<5x96xf32> to vector<5x8xf32>
    %91 = vector.extract_strided_slice %46 {offsets = [0, 48], sizes = [5, 8], strides = [1, 1]} : vector<5x96xf32> to vector<5x8xf32>
    %92 = vector.extract_strided_slice %46 {offsets = [0, 80], sizes = [5, 8], strides = [1, 1]} : vector<5x96xf32> to vector<5x8xf32>
    %cst_44 = arith.constant dense<0.000000e+00> : vector<5x5xf32>
    %93 = tpu.matmul %90, %91, %cst_44 {dimension_numbers = #tpu.dot_dimension_numbers<[1], [1], [0], [0], [0, 0, 1, 0], [], []>} : vector<5x8xf32>, vector<5x8xf32>, vector<5x5xf32> -> vector<5x5xf32>
    %cst_45 = arith.constant 0.353553385 : f32
    %94 = vector.broadcast %cst_45 : f32 to vector<5x5xf32>
    %95 = arith.mulf %93, %94 : vector<5x5xf32>
    %cst_46 = arith.constant dense<0xFF800000> : vector<5xf32>
    %96 = vector.multi_reduction <maximumf>, %95, %cst_46 [1] : vector<5x5xf32> to vector<5xf32>
    %97 = vector.shape_cast %96 : vector<5xf32> to vector<5x1xf32>
    %98 = vector.broadcast %97 : vector<5x1xf32> to vector<5x5xf32>
    %99 = arith.subf %95, %98 : vector<5x5xf32>
    %100 = math.exp %99 : vector<5x5xf32>
    %cst_47 = arith.constant dense<0.000000e+00> : vector<5xf32>
    %101 = vector.multi_reduction <add>, %100, %cst_47 [1] : vector<5x5xf32> to vector<5xf32>
    %102 = vector.shape_cast %101 : vector<5xf32> to vector<5x1xf32>
    %103 = tpu.reciprocal %102 {approx = true} : vector<5x1xf32> -> vector<5x1xf32>
    %104 = vector.broadcast %103 : vector<5x1xf32> to vector<5x5xf32>
    %105 = arith.mulf %100, %104 : vector<5x5xf32>
    %cst_48 = arith.constant dense<0.000000e+00> : vector<5x8xf32>
    %106 = tpu.matmul %105, %92, %cst_48 {dimension_numbers = #tpu.dot_dimension_numbers<[1], [0], [0], [1], [0, 0, 1, 1], [], []>} : vector<5x5xf32>, vector<5x8xf32>, vector<5x8xf32> -> vector<5x8xf32>
    %107 = vector.extract_strided_slice %48 {offsets = [16, 0], sizes = [8, 32], strides = [1, 1]} : vector<32x32xf32> to vector<8x32xf32>
    %cst_49 = arith.constant dense<0.000000e+00> : vector<5x32xf32>
    %108 = tpu.matmul %106, %107, %cst_49 {dimension_numbers = #tpu.dot_dimension_numbers<[1], [0], [0], [1], [0, 0, 1, 1], [], []>} : vector<5x8xf32>, vector<8x32xf32>, vector<5x32xf32> -> vector<5x32xf32>
    %109 = arith.addf %89, %108 : vector<5x32xf32>
    %110 = vector.extract_strided_slice %46 {offsets = [0, 24], sizes = [5, 8], strides = [1, 1]} : vector<5x96xf32> to vector<5x8xf32>
    %111 = vector.extract_strided_slice %46 {offsets = [0, 56], sizes = [5, 8], strides = [1, 1]} : vector<5x96xf32> to vector<5x8xf32>
    %112 = vector.extract_strided_slice %46 {offsets = [0, 88], sizes = [5, 8], strides = [1, 1]} : vector<5x96xf32> to vector<5x8xf32>
    %cst_50 = arith.constant dense<0.000000e+00> : vector<5x5xf32>
    %113 = tpu.matmul %110, %111, %cst_50 {dimension_numbers = #tpu.dot_dimension_numbers<[1], [1], [0], [0], [0, 0, 1, 0], [], []>} : vector<5x8xf32>, vector<5x8xf32>, vector<5x5xf32> -> vector<5x5xf32>
    %cst_51 = arith.constant 0.353553385 : f32
    %114 = vector.broadcast %cst_51 : f32 to vector<5x5xf32>
    %115 = arith.mulf %113, %114 : vector<5x5xf32>
    %cst_52 = arith.constant dense<0xFF800000> : vector<5xf32>
    %116 = vector.multi_reduction <maximumf>, %115, %cst_52 [1] : vector<5x5xf32> to vector<5xf32>
    %117 = vector.shape_cast %116 : vector<5xf32> to vector<5x1xf32>
    %118 = vector.broadcast %117 : vector<5x1xf32> to vector<5x5xf32>
    %119 = arith.subf %115, %118 : vector<5x5xf32>
    %120 = math.exp %119 : vector<5x5xf32>
    %cst_53 = arith.constant dense<0.000000e+00> : vector<5xf32>
    %121 = vector.multi_reduction <add>, %120, %cst_53 [1] : vector<5x5xf32> to vector<5xf32>
    %122 = vector.shape_cast %121 : vector<5xf32> to vector<5x1xf32>
    %123 = tpu.reciprocal %122 {approx = true} : vector<5x1xf32> -> vector<5x1xf32>
    %124 = vector.broadcast %123 : vector<5x1xf32> to vector<5x5xf32>
    %125 = arith.mulf %120, %124 : vector<5x5xf32>
    %cst_54 = arith.constant dense<0.000000e+00> : vector<5x8xf32>
    %126 = tpu.matmul %125, %112, %cst_54 {dimension_numbers = #tpu.dot_dimension_numbers<[1], [0], [0], [1], [0, 0, 1, 1], [], []>} : vector<5x5xf32>, vector<5x8xf32>, vector<5x8xf32> -> vector<5x8xf32>
    %127 = vector.extract_strided_slice %48 {offsets = [24, 0], sizes = [8, 32], strides = [1, 1]} : vector<32x32xf32> to vector<8x32xf32>
    %cst_55 = arith.constant dense<0.000000e+00> : vector<5x32xf32>
    %128 = tpu.matmul %126, %127, %cst_55 {dimension_numbers = #tpu.dot_dimension_numbers<[1], [0], [0], [1], [0, 0, 1, 1], [], []>} : vector<5x8xf32>, vector<8x32xf32>, vector<5x32xf32> -> vector<5x32xf32>
    %129 = arith.addf %109, %128 : vector<5x32xf32>
    %130 = arith.addf %15, %129 : vector<5x32xf32>
    %c0_56 = arith.constant 0 : index
    %c0_57 = arith.constant 0 : index
    %c0_58 = arith.constant 0 : index
    %131 = vector.load %arg11[%c0_56, %c0_57, %c0_58] : memref<2x1x32xf32, #tpu.memory_space<vmem>>, vector<1x1x32xf32>
    %132 = vector.shape_cast %131 : vector<1x1x32xf32> to vector<1x32xf32>
    %133 = vector.broadcast %132 : vector<1x32xf32> to vector<5x32xf32>
    %134 = arith.addf %130, %133 : vector<5x32xf32>
    %c0_59 = arith.constant 0 : index
    %c0_60 = arith.constant 0 : index
    %c0_61 = arith.constant 0 : index
    %135 = vector.load %arg12[%c0_59, %c0_60, %c0_61] : memref<2x1x32xf32, #tpu.memory_space<vmem>>, vector<1x1x32xf32>
    %136 = vector.shape_cast %135 : vector<1x1x32xf32> to vector<1x32xf32>
    %c0_62 = arith.constant 0 : index
    %c0_63 = arith.constant 0 : index
    %c0_64 = arith.constant 0 : index
    %137 = vector.load %arg13[%c0_62, %c0_63, %c0_64] : memref<2x1x32xf32, #tpu.memory_space<vmem>>, vector<1x1x32xf32>
    %138 = vector.shape_cast %137 : vector<1x1x32xf32> to vector<1x32xf32>
    %cst_65 = arith.constant dense<0.000000e+00> : vector<5xf32>
    %139 = vector.multi_reduction <add>, %134, %cst_65 [1] : vector<5x32xf32> to vector<5xf32>
    %140 = vector.shape_cast %139 : vector<5xf32> to vector<5x1xf32>
    %cst_66 = arith.constant 3.200000e+01 : f32
    %141 = vector.broadcast %cst_66 : f32 to vector<5x1xf32>
    %142 = arith.divf %140, %141 : vector<5x1xf32>
    %143 = vector.broadcast %142 : vector<5x1xf32> to vector<5x32xf32>
    %144 = arith.subf %134, %143 : vector<5x32xf32>
    %145 = arith.mulf %144, %144 : vector<5x32xf32>
    %cst_67 = arith.constant dense<0.000000e+00> : vector<5xf32>
    %146 = vector.multi_reduction <add>, %145, %cst_67 [1] : vector<5x32xf32> to vector<5xf32>
    %147 = vector.shape_cast %146 : vector<5xf32> to vector<5x1xf32>
    %cst_68 = arith.constant 3.200000e+01 : f32
    %148 = vector.broadcast %cst_68 : f32 to vector<5x1xf32>
    %149 = arith.divf %147, %148 : vector<5x1xf32>
    %cst_69 = arith.constant 9.99999997E-7 : f32
    %150 = vector.broadcast %cst_69 : f32 to vector<5x1xf32>
    %151 = arith.addf %149, %150 : vector<5x1xf32>
    %152 = math.rsqrt %151 : vector<5x1xf32>
    %153 = vector.broadcast %152 : vector<5x1xf32> to vector<5x32xf32>
    %154 = arith.mulf %144, %153 : vector<5x32xf32>
    %155 = vector.broadcast %136 : vector<1x32xf32> to vector<5x32xf32>
    %156 = arith.mulf %154, %155 : vector<5x32xf32>
    %157 = vector.broadcast %138 : vector<1x32xf32> to vector<5x32xf32>
    %158 = arith.addf %156, %157 : vector<5x32xf32>
    %c0_70 = arith.constant 0 : index
    %c0_71 = arith.constant 0 : index
    %c0_72 = arith.constant 0 : index
    %159 = vector.load %arg14[%c0_70, %c0_71, %c0_72] : memref<2x32x128xf32, #tpu.memory_space<vmem>>, vector<1x32x128xf32>
    %160 = vector.shape_cast %159 : vector<1x32x128xf32> to vector<32x128xf32>
    %cst_73 = arith.constant dense<0.000000e+00> : vector<5x128xf32>
    %161 = tpu.matmul %158, %160, %cst_73 {dimension_numbers = #tpu.dot_dimension_numbers<[1], [0], [0], [1], [0, 0, 1, 1], [], []>} : vector<5x32xf32>, vector<32x128xf32>, vector<5x128xf32> -> vector<5x128xf32>
    %c0_74 = arith.constant 0 : index
    %c0_75 = arith.constant 0 : index
    %c0_76 = arith.constant 0 : index
    %162 = vector.load %arg15[%c0_74, %c0_75, %c0_76] : memref<2x1x128xf32, #tpu.memory_space<vmem>>, vector<1x1x128xf32>
    %163 = vector.shape_cast %162 : vector<1x1x128xf32> to vector<1x128xf32>
    %164 = vector.broadcast %163 : vector<1x128xf32> to vector<5x128xf32>
    %165 = arith.addf %161, %164 : vector<5x128xf32>
    %cst_77 = arith.constant 5.000000e-01 : f32
    %166 = vector.broadcast %cst_77 : f32 to vector<5x128xf32>
    %167 = arith.mulf %166, %165 : vector<5x128xf32>
    %cst_78 = arith.constant 4.471500e-02 : f32
    %168 = vector.broadcast %cst_78 : f32 to vector<5x128xf32>
    %169 = arith.mulf %168, %165 : vector<5x128xf32>
    %170 = arith.mulf %169, %165 : vector<5x128xf32>
    %171 = arith.mulf %170, %165 : vector<5x128xf32>
    %172 = arith.addf %165, %171 : vector<5x128xf32>
    %cst_79 = arith.constant 0.797884583 : f32
    %173 = vector.broadcast %cst_79 : f32 to vector<5x128xf32>
    %174 = arith.mulf %173, %172 : vector<5x128xf32>
    %175 = math.tanh %174 : vector<5x128xf32>
    %cst_80 = arith.constant 1.000000e+00 : f32
    %176 = vector.broadcast %cst_80 : f32 to vector<5x128xf32>
    %177 = arith.addf %176, %175 : vector<5x128xf32>
    %178 = arith.mulf %167, %177 : vector<5x128xf32>
    %c0_81 = arith.constant 0 : index
    %c0_82 = arith.constant 0 : index
    %c0_83 = arith.constant 0 : index
    %179 = vector.load %arg16[%c0_81, %c0_82, %c0_83] : memref<2x128x32xf32, #tpu.memory_space<vmem>>, vector<1x128x32xf32>
    %180 = vector.shape_cast %179 : vector<1x128x32xf32> to vector<128x32xf32>
    %cst_84 = arith.constant dense<0.000000e+00> : vector<5x32xf32>
    %181 = tpu.matmul %178, %180, %cst_84 {dimension_numbers = #tpu.dot_dimension_numbers<[1], [0], [0], [1], [0, 0, 1, 1], [], []>} : vector<5x128xf32>, vector<128x32xf32>, vector<5x32xf32> -> vector<5x32xf32>
    %182 = arith.addf %134, %181 : vector<5x32xf32>
    %c0_85 = arith.constant 0 : index
    %c0_86 = arith.constant 0 : index
    %c0_87 = arith.constant 0 : index
    %183 = vector.load %arg17[%c0_85, %c0_86, %c0_87] : memref<2x1x32xf32, #tpu.memory_space<vmem>>, vector<1x1x32xf32>
    %184 = vector.shape_cast %183 : vector<1x1x32xf32> to vector<1x32xf32>
    %185 = vector.broadcast %184 : vector<1x32xf32> to vector<5x32xf32>
    %186 = arith.addf %182, %185 : vector<5x32xf32>
    %c1 = arith.constant 1 : index
    %c0_88 = arith.constant 0 : index
    %c0_89 = arith.constant 0 : index
    %187 = vector.load %arg6[%c1, %c0_88, %c0_89] : memref<2x1x32xf32, #tpu.memory_space<vmem>>, vector<1x1x32xf32>
    %188 = vector.shape_cast %187 : vector<1x1x32xf32> to vector<1x32xf32>
    %c1_90 = arith.constant 1 : index
    %c0_91 = arith.constant 0 : index
    %c0_92 = arith.constant 0 : index
    %189 = vector.load %arg7[%c1_90, %c0_91, %c0_92] : memref<2x1x32xf32, #tpu.memory_space<vmem>>, vector<1x1x32xf32>
    %190 = vector.shape_cast %189 : vector<1x1x32xf32> to vector<1x32xf32>
    %cst_93 = arith.constant dense<0.000000e+00> : vector<5xf32>
    %191 = vector.multi_reduction <add>, %186, %cst_93 [1] : vector<5x32xf32> to vector<5xf32>
    %192 = vector.shape_cast %191 : vector<5xf32> to vector<5x1xf32>
    %cst_94 = arith.constant 3.200000e+01 : f32
    %193 = vector.broadcast %cst_94 : f32 to vector<5x1xf32>
    %194 = arith.divf %192, %193 : vector<5x1xf32>
    %195 = vector.broadcast %194 : vector<5x1xf32> to vector<5x32xf32>
    %196 = arith.subf %186, %195 : vector<5x32xf32>
    %197 = arith.mulf %196, %196 : vector<5x32xf32>
    %cst_95 = arith.constant dense<0.000000e+00> : vector<5xf32>
    %198 = vector.multi_reduction <add>, %197, %cst_95 [1] : vector<5x32xf32> to vector<5xf32>
    %199 = vector.shape_cast %198 : vector<5xf32> to vector<5x1xf32>
    %cst_96 = arith.constant 3.200000e+01 : f32
    %200 = vector.broadcast %cst_96 : f32 to vector<5x1xf32>
    %201 = arith.divf %199, %200 : vector<5x1xf32>
    %cst_97 = arith.constant 9.99999997E-7 : f32
    %202 = vector.broadcast %cst_97 : f32 to vector<5x1xf32>
    %203 = arith.addf %201, %202 : vector<5x1xf32>
    %204 = math.rsqrt %203 : vector<5x1xf32>
    %205 = vector.broadcast %204 : vector<5x1xf32> to vector<5x32xf32>
    %206 = arith.mulf %196, %205 : vector<5x32xf32>
    %207 = vector.broadcast %188 : vector<1x32xf32> to vector<5x32xf32>
    %208 = arith.mulf %206, %207 : vector<5x32xf32>
    %209 = vector.broadcast %190 : vector<1x32xf32> to vector<5x32xf32>
    %210 = arith.addf %208, %209 : vector<5x32xf32>
    %c1_98 = arith.constant 1 : index
    %c0_99 = arith.constant 0 : index
    %c0_100 = arith.constant 0 : index
    %211 = vector.load %arg8[%c1_98, %c0_99, %c0_100] : memref<2x32x96xf32, #tpu.memory_space<vmem>>, vector<1x32x96xf32>
    %212 = vector.shape_cast %211 : vector<1x32x96xf32> to vector<32x96xf32>
    %cst_101 = arith.constant dense<0.000000e+00> : vector<5x96xf32>
    %213 = tpu.matmul %210, %212, %cst_101 {dimension_numbers = #tpu.dot_dimension_numbers<[1], [0], [0], [1], [0, 0, 1, 1], [], []>} : vector<5x32xf32>, vector<32x96xf32>, vector<5x96xf32> -> vector<5x96xf32>
    %c1_102 = arith.constant 1 : index
    %c0_103 = arith.constant 0 : index
    %c0_104 = arith.constant 0 : index
    %214 = vector.load %arg9[%c1_102, %c0_103, %c0_104] : memref<2x1x96xf32, #tpu.memory_space<vmem>>, vector<1x1x96xf32>
    %215 = vector.shape_cast %214 : vector<1x1x96xf32> to vector<1x96xf32>
    %216 = vector.broadcast %215 : vector<1x96xf32> to vector<5x96xf32>
    %217 = arith.addf %213, %216 : vector<5x96xf32>
    %c1_105 = arith.constant 1 : index
    %c0_106 = arith.constant 0 : index
    %c0_107 = arith.constant 0 : index
    %218 = vector.load %arg10[%c1_105, %c0_106, %c0_107] : memref<2x32x32xf32, #tpu.memory_space<vmem>>, vector<1x32x32xf32>
    %219 = vector.shape_cast %218 : vector<1x32x32xf32> to vector<32x32xf32>
    %cst_108 = arith.constant 0.000000e+00 : f32
    %220 = vector.broadcast %cst_108 : f32 to vector<5x32xf32>
    %221 = vector.extract_strided_slice %217 {offsets = [0, 0], sizes = [5, 8], strides = [1, 1]} : vector<5x96xf32> to vector<5x8xf32>
    %222 = vector.extract_strided_slice %217 {offsets = [0, 32], sizes = [5, 8], strides = [1, 1]} : vector<5x96xf32> to vector<5x8xf32>
    %223 = vector.extract_strided_slice %217 {offsets = [0, 64], sizes = [5, 8], strides = [1, 1]} : vector<5x96xf32> to vector<5x8xf32>
    %cst_109 = arith.constant dense<0.000000e+00> : vector<5x5xf32>
    %224 = tpu.matmul %221, %222, %cst_109 {dimension_numbers = #tpu.dot_dimension_numbers<[1], [1], [0], [0], [0, 0, 1, 0], [], []>} : vector<5x8xf32>, vector<5x8xf32>, vector<5x5xf32> -> vector<5x5xf32>
    %cst_110 = arith.constant 0.353553385 : f32
    %225 = vector.broadcast %cst_110 : f32 to vector<5x5xf32>
    %226 = arith.mulf %224, %225 : vector<5x5xf32>
    %cst_111 = arith.constant dense<0xFF800000> : vector<5xf32>
    %227 = vector.multi_reduction <maximumf>, %226, %cst_111 [1] : vector<5x5xf32> to vector<5xf32>
    %228 = vector.shape_cast %227 : vector<5xf32> to vector<5x1xf32>
    %229 = vector.broadcast %228 : vector<5x1xf32> to vector<5x5xf32>
    %230 = arith.subf %226, %229 : vector<5x5xf32>
    %231 = math.exp %230 : vector<5x5xf32>
    %cst_112 = arith.constant dense<0.000000e+00> : vector<5xf32>
    %232 = vector.multi_reduction <add>, %231, %cst_112 [1] : vector<5x5xf32> to vector<5xf32>
    %233 = vector.shape_cast %232 : vector<5xf32> to vector<5x1xf32>
    %234 = tpu.reciprocal %233 {approx = true} : vector<5x1xf32> -> vector<5x1xf32>
    %235 = vector.broadcast %234 : vector<5x1xf32> to vector<5x5xf32>
    %236 = arith.mulf %231, %235 : vector<5x5xf32>
    %cst_113 = arith.constant dense<0.000000e+00> : vector<5x8xf32>
    %237 = tpu.matmul %236, %223, %cst_113 {dimension_numbers = #tpu.dot_dimension_numbers<[1], [0], [0], [1], [0, 0, 1, 1], [], []>} : vector<5x5xf32>, vector<5x8xf32>, vector<5x8xf32> -> vector<5x8xf32>
    %238 = vector.extract_strided_slice %219 {offsets = [0, 0], sizes = [8, 32], strides = [1, 1]} : vector<32x32xf32> to vector<8x32xf32>
    %cst_114 = arith.constant dense<0.000000e+00> : vector<5x32xf32>
    %239 = tpu.matmul %237, %238, %cst_114 {dimension_numbers = #tpu.dot_dimension_numbers<[1], [0], [0], [1], [0, 0, 1, 1], [], []>} : vector<5x8xf32>, vector<8x32xf32>, vector<5x32xf32> -> vector<5x32xf32>
    %240 = arith.addf %220, %239 : vector<5x32xf32>
    %241 = vector.extract_strided_slice %217 {offsets = [0, 8], sizes = [5, 8], strides = [1, 1]} : vector<5x96xf32> to vector<5x8xf32>
    %242 = vector.extract_strided_slice %217 {offsets = [0, 40], sizes = [5, 8], strides = [1, 1]} : vector<5x96xf32> to vector<5x8xf32>
    %243 = vector.extract_strided_slice %217 {offsets = [0, 72], sizes = [5, 8], strides = [1, 1]} : vector<5x96xf32> to vector<5x8xf32>
    %cst_115 = arith.constant dense<0.000000e+00> : vector<5x5xf32>
    %244 = tpu.matmul %241, %242, %cst_115 {dimension_numbers = #tpu.dot_dimension_numbers<[1], [1], [0], [0], [0, 0, 1, 0], [], []>} : vector<5x8xf32>, vector<5x8xf32>, vector<5x5xf32> -> vector<5x5xf32>
    %cst_116 = arith.constant 0.353553385 : f32
    %245 = vector.broadcast %cst_116 : f32 to vector<5x5xf32>
    %246 = arith.mulf %244, %245 : vector<5x5xf32>
    %cst_117 = arith.constant dense<0xFF800000> : vector<5xf32>
    %247 = vector.multi_reduction <maximumf>, %246, %cst_117 [1] : vector<5x5xf32> to vector<5xf32>
    %248 = vector.shape_cast %247 : vector<5xf32> to vector<5x1xf32>
    %249 = vector.broadcast %248 : vector<5x1xf32> to vector<5x5xf32>
    %250 = arith.subf %246, %249 : vector<5x5xf32>
    %251 = math.exp %250 : vector<5x5xf32>
    %cst_118 = arith.constant dense<0.000000e+00> : vector<5xf32>
    %252 = vector.multi_reduction <add>, %251, %cst_118 [1] : vector<5x5xf32> to vector<5xf32>
    %253 = vector.shape_cast %252 : vector<5xf32> to vector<5x1xf32>
    %254 = tpu.reciprocal %253 {approx = true} : vector<5x1xf32> -> vector<5x1xf32>
    %255 = vector.broadcast %254 : vector<5x1xf32> to vector<5x5xf32>
    %256 = arith.mulf %251, %255 : vector<5x5xf32>
    %cst_119 = arith.constant dense<0.000000e+00> : vector<5x8xf32>
    %257 = tpu.matmul %256, %243, %cst_119 {dimension_numbers = #tpu.dot_dimension_numbers<[1], [0], [0], [1], [0, 0, 1, 1], [], []>} : vector<5x5xf32>, vector<5x8xf32>, vector<5x8xf32> -> vector<5x8xf32>
    %258 = vector.extract_strided_slice %219 {offsets = [8, 0], sizes = [8, 32], strides = [1, 1]} : vector<32x32xf32> to vector<8x32xf32>
    %cst_120 = arith.constant dense<0.000000e+00> : vector<5x32xf32>
    %259 = tpu.matmul %257, %258, %cst_120 {dimension_numbers = #tpu.dot_dimension_numbers<[1], [0], [0], [1], [0, 0, 1, 1], [], []>} : vector<5x8xf32>, vector<8x32xf32>, vector<5x32xf32> -> vector<5x32xf32>
    %260 = arith.addf %240, %259 : vector<5x32xf32>
    %261 = vector.extract_strided_slice %217 {offsets = [0, 16], sizes = [5, 8], strides = [1, 1]} : vector<5x96xf32> to vector<5x8xf32>
    %262 = vector.extract_strided_slice %217 {offsets = [0, 48], sizes = [5, 8], strides = [1, 1]} : vector<5x96xf32> to vector<5x8xf32>
    %263 = vector.extract_strided_slice %217 {offsets = [0, 80], sizes = [5, 8], strides = [1, 1]} : vector<5x96xf32> to vector<5x8xf32>
    %cst_121 = arith.constant dense<0.000000e+00> : vector<5x5xf32>
    %264 = tpu.matmul %261, %262, %cst_121 {dimension_numbers = #tpu.dot_dimension_numbers<[1], [1], [0], [0], [0, 0, 1, 0], [], []>} : vector<5x8xf32>, vector<5x8xf32>, vector<5x5xf32> -> vector<5x5xf32>
    %cst_122 = arith.constant 0.353553385 : f32
    %265 = vector.broadcast %cst_122 : f32 to vector<5x5xf32>
    %266 = arith.mulf %264, %265 : vector<5x5xf32>
    %cst_123 = arith.constant dense<0xFF800000> : vector<5xf32>
    %267 = vector.multi_reduction <maximumf>, %266, %cst_123 [1] : vector<5x5xf32> to vector<5xf32>
    %268 = vector.shape_cast %267 : vector<5xf32> to vector<5x1xf32>
    %269 = vector.broadcast %268 : vector<5x1xf32> to vector<5x5xf32>
    %270 = arith.subf %266, %269 : vector<5x5xf32>
    %271 = math.exp %270 : vector<5x5xf32>
    %cst_124 = arith.constant dense<0.000000e+00> : vector<5xf32>
    %272 = vector.multi_reduction <add>, %271, %cst_124 [1] : vector<5x5xf32> to vector<5xf32>
    %273 = vector.shape_cast %272 : vector<5xf32> to vector<5x1xf32>
    %274 = tpu.reciprocal %273 {approx = true} : vector<5x1xf32> -> vector<5x1xf32>
    %275 = vector.broadcast %274 : vector<5x1xf32> to vector<5x5xf32>
    %276 = arith.mulf %271, %275 : vector<5x5xf32>
    %cst_125 = arith.constant dense<0.000000e+00> : vector<5x8xf32>
    %277 = tpu.matmul %276, %263, %cst_125 {dimension_numbers = #tpu.dot_dimension_numbers<[1], [0], [0], [1], [0, 0, 1, 1], [], []>} : vector<5x5xf32>, vector<5x8xf32>, vector<5x8xf32> -> vector<5x8xf32>
    %278 = vector.extract_strided_slice %219 {offsets = [16, 0], sizes = [8, 32], strides = [1, 1]} : vector<32x32xf32> to vector<8x32xf32>
    %cst_126 = arith.constant dense<0.000000e+00> : vector<5x32xf32>
    %279 = tpu.matmul %277, %278, %cst_126 {dimension_numbers = #tpu.dot_dimension_numbers<[1], [0], [0], [1], [0, 0, 1, 1], [], []>} : vector<5x8xf32>, vector<8x32xf32>, vector<5x32xf32> -> vector<5x32xf32>
    %280 = arith.addf %260, %279 : vector<5x32xf32>
    %281 = vector.extract_strided_slice %217 {offsets = [0, 24], sizes = [5, 8], strides = [1, 1]} : vector<5x96xf32> to vector<5x8xf32>
    %282 = vector.extract_strided_slice %217 {offsets = [0, 56], sizes = [5, 8], strides = [1, 1]} : vector<5x96xf32> to vector<5x8xf32>
    %283 = vector.extract_strided_slice %217 {offsets = [0, 88], sizes = [5, 8], strides = [1, 1]} : vector<5x96xf32> to vector<5x8xf32>
    %cst_127 = arith.constant dense<0.000000e+00> : vector<5x5xf32>
    %284 = tpu.matmul %281, %282, %cst_127 {dimension_numbers = #tpu.dot_dimension_numbers<[1], [1], [0], [0], [0, 0, 1, 0], [], []>} : vector<5x8xf32>, vector<5x8xf32>, vector<5x5xf32> -> vector<5x5xf32>
    %cst_128 = arith.constant 0.353553385 : f32
    %285 = vector.broadcast %cst_128 : f32 to vector<5x5xf32>
    %286 = arith.mulf %284, %285 : vector<5x5xf32>
    %cst_129 = arith.constant dense<0xFF800000> : vector<5xf32>
    %287 = vector.multi_reduction <maximumf>, %286, %cst_129 [1] : vector<5x5xf32> to vector<5xf32>
    %288 = vector.shape_cast %287 : vector<5xf32> to vector<5x1xf32>
    %289 = vector.broadcast %288 : vector<5x1xf32> to vector<5x5xf32>
    %290 = arith.subf %286, %289 : vector<5x5xf32>
    %291 = math.exp %290 : vector<5x5xf32>
    %cst_130 = arith.constant dense<0.000000e+00> : vector<5xf32>
    %292 = vector.multi_reduction <add>, %291, %cst_130 [1] : vector<5x5xf32> to vector<5xf32>
    %293 = vector.shape_cast %292 : vector<5xf32> to vector<5x1xf32>
    %294 = tpu.reciprocal %293 {approx = true} : vector<5x1xf32> -> vector<5x1xf32>
    %295 = vector.broadcast %294 : vector<5x1xf32> to vector<5x5xf32>
    %296 = arith.mulf %291, %295 : vector<5x5xf32>
    %cst_131 = arith.constant dense<0.000000e+00> : vector<5x8xf32>
    %297 = tpu.matmul %296, %283, %cst_131 {dimension_numbers = #tpu.dot_dimension_numbers<[1], [0], [0], [1], [0, 0, 1, 1], [], []>} : vector<5x5xf32>, vector<5x8xf32>, vector<5x8xf32> -> vector<5x8xf32>
    %298 = vector.extract_strided_slice %219 {offsets = [24, 0], sizes = [8, 32], strides = [1, 1]} : vector<32x32xf32> to vector<8x32xf32>
    %cst_132 = arith.constant dense<0.000000e+00> : vector<5x32xf32>
    %299 = tpu.matmul %297, %298, %cst_132 {dimension_numbers = #tpu.dot_dimension_numbers<[1], [0], [0], [1], [0, 0, 1, 1], [], []>} : vector<5x8xf32>, vector<8x32xf32>, vector<5x32xf32> -> vector<5x32xf32>
    %300 = arith.addf %280, %299 : vector<5x32xf32>
    %301 = arith.addf %186, %300 : vector<5x32xf32>
    %c1_133 = arith.constant 1 : index
    %c0_134 = arith.constant 0 : index
    %c0_135 = arith.constant 0 : index
    %302 = vector.load %arg11[%c1_133, %c0_134, %c0_135] : memref<2x1x32xf32, #tpu.memory_space<vmem>>, vector<1x1x32xf32>
    %303 = vector.shape_cast %302 : vector<1x1x32xf32> to vector<1x32xf32>
    %304 = vector.broadcast %303 : vector<1x32xf32> to vector<5x32xf32>
    %305 = arith.addf %301, %304 : vector<5x32xf32>
    %c1_136 = arith.constant 1 : index
    %c0_137 = arith.constant 0 : index
    %c0_138 = arith.constant 0 : index
    %306 = vector.load %arg12[%c1_136, %c0_137, %c0_138] : memref<2x1x32xf32, #tpu.memory_space<vmem>>, vector<1x1x32xf32>
    %307 = vector.shape_cast %306 : vector<1x1x32xf32> to vector<1x32xf32>
    %c1_139 = arith.constant 1 : index
    %c0_140 = arith.constant 0 : index
    %c0_141 = arith.constant 0 : index
    %308 = vector.load %arg13[%c1_139, %c0_140, %c0_141] : memref<2x1x32xf32, #tpu.memory_space<vmem>>, vector<1x1x32xf32>
    %309 = vector.shape_cast %308 : vector<1x1x32xf32> to vector<1x32xf32>
    %cst_142 = arith.constant dense<0.000000e+00> : vector<5xf32>
    %310 = vector.multi_reduction <add>, %305, %cst_142 [1] : vector<5x32xf32> to vector<5xf32>
    %311 = vector.shape_cast %310 : vector<5xf32> to vector<5x1xf32>
    %cst_143 = arith.constant 3.200000e+01 : f32
    %312 = vector.broadcast %cst_143 : f32 to vector<5x1xf32>
    %313 = arith.divf %311, %312 : vector<5x1xf32>
    %314 = vector.broadcast %313 : vector<5x1xf32> to vector<5x32xf32>
    %315 = arith.subf %305, %314 : vector<5x32xf32>
    %316 = arith.mulf %315, %315 : vector<5x32xf32>
    %cst_144 = arith.constant dense<0.000000e+00> : vector<5xf32>
    %317 = vector.multi_reduction <add>, %316, %cst_144 [1] : vector<5x32xf32> to vector<5xf32>
    %318 = vector.shape_cast %317 : vector<5xf32> to vector<5x1xf32>
    %cst_145 = arith.constant 3.200000e+01 : f32
    %319 = vector.broadcast %cst_145 : f32 to vector<5x1xf32>
    %320 = arith.divf %318, %319 : vector<5x1xf32>
    %cst_146 = arith.constant 9.99999997E-7 : f32
    %321 = vector.broadcast %cst_146 : f32 to vector<5x1xf32>
    %322 = arith.addf %320, %321 : vector<5x1xf32>
    %323 = math.rsqrt %322 : vector<5x1xf32>
    %324 = vector.broadcast %323 : vector<5x1xf32> to vector<5x32xf32>
    %325 = arith.mulf %315, %324 : vector<5x32xf32>
    %326 = vector.broadcast %307 : vector<1x32xf32> to vector<5x32xf32>
    %327 = arith.mulf %325, %326 : vector<5x32xf32>
    %328 = vector.broadcast %309 : vector<1x32xf32> to vector<5x32xf32>
    %329 = arith.addf %327, %328 : vector<5x32xf32>
    %c1_147 = arith.constant 1 : index
    %c0_148 = arith.constant 0 : index
    %c0_149 = arith.constant 0 : index
    %330 = vector.load %arg14[%c1_147, %c0_148, %c0_149] : memref<2x32x128xf32, #tpu.memory_space<vmem>>, vector<1x32x128xf32>
    %331 = vector.shape_cast %330 : vector<1x32x128xf32> to vector<32x128xf32>
    %cst_150 = arith.constant dense<0.000000e+00> : vector<5x128xf32>
    %332 = tpu.matmul %329, %331, %cst_150 {dimension_numbers = #tpu.dot_dimension_numbers<[1], [0], [0], [1], [0, 0, 1, 1], [], []>} : vector<5x32xf32>, vector<32x128xf32>, vector<5x128xf32> -> vector<5x128xf32>
    %c1_151 = arith.constant 1 : index
    %c0_152 = arith.constant 0 : index
    %c0_153 = arith.constant 0 : index
    %333 = vector.load %arg15[%c1_151, %c0_152, %c0_153] : memref<2x1x128xf32, #tpu.memory_space<vmem>>, vector<1x1x128xf32>
    %334 = vector.shape_cast %333 : vector<1x1x128xf32> to vector<1x128xf32>
    %335 = vector.broadcast %334 : vector<1x128xf32> to vector<5x128xf32>
    %336 = arith.addf %332, %335 : vector<5x128xf32>
    %cst_154 = arith.constant 5.000000e-01 : f32
    %337 = vector.broadcast %cst_154 : f32 to vector<5x128xf32>
    %338 = arith.mulf %337, %336 : vector<5x128xf32>
    %cst_155 = arith.constant 4.471500e-02 : f32
    %339 = vector.broadcast %cst_155 : f32 to vector<5x128xf32>
    %340 = arith.mulf %339, %336 : vector<5x128xf32>
    %341 = arith.mulf %340, %336 : vector<5x128xf32>
    %342 = arith.mulf %341, %336 : vector<5x128xf32>
    %343 = arith.addf %336, %342 : vector<5x128xf32>
    %cst_156 = arith.constant 0.797884583 : f32
    %344 = vector.broadcast %cst_156 : f32 to vector<5x128xf32>
    %345 = arith.mulf %344, %343 : vector<5x128xf32>
    %346 = math.tanh %345 : vector<5x128xf32>
    %cst_157 = arith.constant 1.000000e+00 : f32
    %347 = vector.broadcast %cst_157 : f32 to vector<5x128xf32>
    %348 = arith.addf %347, %346 : vector<5x128xf32>
    %349 = arith.mulf %338, %348 : vector<5x128xf32>
    %c1_158 = arith.constant 1 : index
    %c0_159 = arith.constant 0 : index
    %c0_160 = arith.constant 0 : index
    %350 = vector.load %arg16[%c1_158, %c0_159, %c0_160] : memref<2x128x32xf32, #tpu.memory_space<vmem>>, vector<1x128x32xf32>
    %351 = vector.shape_cast %350 : vector<1x128x32xf32> to vector<128x32xf32>
    %cst_161 = arith.constant dense<0.000000e+00> : vector<5x32xf32>
    %352 = tpu.matmul %349, %351, %cst_161 {dimension_numbers = #tpu.dot_dimension_numbers<[1], [0], [0], [1], [0, 0, 1, 1], [], []>} : vector<5x128xf32>, vector<128x32xf32>, vector<5x32xf32> -> vector<5x32xf32>
    %353 = arith.addf %305, %352 : vector<5x32xf32>
    %c1_162 = arith.constant 1 : index
    %c0_163 = arith.constant 0 : index
    %c0_164 = arith.constant 0 : index
    %354 = vector.load %arg17[%c1_162, %c0_163, %c0_164] : memref<2x1x32xf32, #tpu.memory_space<vmem>>, vector<1x1x32xf32>
    %355 = vector.shape_cast %354 : vector<1x1x32xf32> to vector<1x32xf32>
    %356 = vector.broadcast %355 : vector<1x32xf32> to vector<5x32xf32>
    %357 = arith.addf %353, %356 : vector<5x32xf32>
    %c0_165 = arith.constant 0 : index
    %c0_166 = arith.constant 0 : index
    %358 = vector.load %arg18[%c0_165, %c0_166] : memref<1x32xf32, #tpu.memory_space<vmem>>, vector<1x32xf32>
    %c0_167 = arith.constant 0 : index
    %c0_168 = arith.constant 0 : index
    %359 = vector.load %arg19[%c0_167, %c0_168] : memref<1x32xf32, #tpu.memory_space<vmem>>, vector<1x32xf32>
    %cst_169 = arith.constant dense<0.000000e+00> : vector<5xf32>
    %360 = vector.multi_reduction <add>, %357, %cst_169 [1] : vector<5x32xf32> to vector<5xf32>
    %361 = vector.shape_cast %360 : vector<5xf32> to vector<5x1xf32>
    %cst_170 = arith.constant 3.200000e+01 : f32
    %362 = vector.broadcast %cst_170 : f32 to vector<5x1xf32>
    %363 = arith.divf %361, %362 : vector<5x1xf32>
    %364 = vector.broadcast %363 : vector<5x1xf32> to vector<5x32xf32>
    %365 = arith.subf %357, %364 : vector<5x32xf32>
    %366 = arith.mulf %365, %365 : vector<5x32xf32>
    %cst_171 = arith.constant dense<0.000000e+00> : vector<5xf32>
    %367 = vector.multi_reduction <add>, %366, %cst_171 [1] : vector<5x32xf32> to vector<5xf32>
    %368 = vector.shape_cast %367 : vector<5xf32> to vector<5x1xf32>
    %cst_172 = arith.constant 3.200000e+01 : f32
    %369 = vector.broadcast %cst_172 : f32 to vector<5x1xf32>
    %370 = arith.divf %368, %369 : vector<5x1xf32>
    %cst_173 = arith.constant 9.99999997E-7 : f32
    %371 = vector.broadcast %cst_173 : f32 to vector<5x1xf32>
    %372 = arith.addf %370, %371 : vector<5x1xf32>
    %373 = math.rsqrt %372 : vector<5x1xf32>
    %374 = vector.broadcast %373 : vector<5x1xf32> to vector<5x32xf32>
    %375 = arith.mulf %365, %374 : vector<5x32xf32>
    %376 = vector.broadcast %358 : vector<1x32xf32> to vector<5x32xf32>
    %377 = arith.mulf %375, %376 : vector<5x32xf32>
    %378 = vector.broadcast %359 : vector<1x32xf32> to vector<5x32xf32>
    %379 = arith.addf %377, %378 : vector<5x32xf32>
    %380 = vector.extract_strided_slice %379 {offsets = [0, 0], sizes = [1, 32], strides = [1, 1]} : vector<5x32xf32> to vector<1x32xf32>
    %c0_174 = arith.constant 0 : index
    %c0_175 = arith.constant 0 : index
    %381 = vector.load %arg20[%c0_174, %c0_175] : memref<32x48xf32, #tpu.memory_space<vmem>>, vector<32x48xf32>
    %cst_176 = arith.constant dense<0.000000e+00> : vector<1x48xf32>
    %382 = tpu.matmul %380, %381, %cst_176 {dimension_numbers = #tpu.dot_dimension_numbers<[1], [0], [0], [1], [0, 0, 1, 1], [], []>} : vector<1x32xf32>, vector<32x48xf32>, vector<1x48xf32> -> vector<1x48xf32>
    %c0_177 = arith.constant 0 : index
    %c0_178 = arith.constant 0 : index
    %383 = vector.load %arg21[%c0_177, %c0_178] : memref<1x48xf32, #tpu.memory_space<vmem>>, vector<1x48xf32>
    %384 = arith.addf %382, %383 : vector<1x48xf32>
    %c0_179 = arith.constant 0 : index
    %c0_180 = arith.constant 0 : index
    %385 = vector.load %arg22[%c0_179, %c0_180] : memref<48x8xf32, #tpu.memory_space<vmem>>, vector<48x8xf32>
    %cst_181 = arith.constant dense<0.000000e+00> : vector<1x8xf32>
    %386 = tpu.matmul %384, %385, %cst_181 {dimension_numbers = #tpu.dot_dimension_numbers<[1], [0], [0], [1], [0, 0, 1, 1], [], []>} : vector<1x48xf32>, vector<48x8xf32>, vector<1x8xf32> -> vector<1x8xf32>
    %c0_182 = arith.constant 0 : index
    %c0_183 = arith.constant 0 : index
    %387 = vector.load %arg23[%c0_182, %c0_183] : memref<1x8xf32, #tpu.memory_space<vmem>>, vector<1x8xf32>
    %388 = arith.addf %386, %387 : vector<1x8xf32>
    %c0_184 = arith.constant 0 : index
    %c0_185 = arith.constant 0 : index
    %c0_186 = arith.constant 0 : index
    %389 = vector.load %arg24[%c0_184, %c0_185, %c0_186] : memref<1x1x8xf32, #tpu.memory_space<vmem>>, vector<1x1x8xf32>
    %390 = vector.shape_cast %389 : vector<1x1x8xf32> to vector<1x8xf32>
    %391 = vector.shape_cast %388 : vector<1x8xf32> to vector<1x1x8xf32>
    tpu.vector_store %arg24[%c0_184, %c0_185, %c0_186], %391 {strides = array<i32>} : memref<1x1x8xf32, #tpu.memory_space<vmem>>, vector<1x1x8xf32>,
    return
  }
  func.func @transform_0(%arg0: i32) -> (i32, i32, i32) {
    %c0_i32 = arith.constant 0 : i32
    %c0_i32_0 = arith.constant 0 : i32
    %c0_i32_1 = arith.constant 0 : i32
    return %arg0, %c0_i32, %c0_i32_0 : i32, i32, i32
  }
  func.func @transform_1(%arg0: i32) -> (i32, i32) {
    %c0_i32 = arith.constant 0 : i32
    %c0_i32_0 = arith.constant 0 : i32
    %c0_i32_1 = arith.constant 0 : i32
    return %c0_i32, %c0_i32_0 : i32, i32
  }
  func.func @transform_2(%arg0: i32) -> (i32, i32) {
    %c0_i32 = arith.constant 0 : i32
    %c0_i32_0 = arith.constant 0 : i32
    %c0_i32_1 = arith.constant 0 : i32
    return %c0_i32, %c0_i32_0 : i32, i32
  }
  func.func @transform_3(%arg0: i32) -> (i32, i32) {
    %c0_i32 = arith.constant 0 : i32
    %c0_i32_0 = arith.constant 0 : i32
    %c0_i32_1 = arith.constant 0 : i32
    return %c0_i32, %c0_i32_0 : i32, i32
  }
  func.func @transform_4(%arg0: i32) -> (i32, i32) {
    %c0_i32 = arith.constant 0 : i32
    %c0_i32_0 = arith.constant 0 : i32
    %c0_i32_1 = arith.constant 0 : i32
    return %c0_i32, %c0_i32_0 : i32, i32
  }
  func.func @transform_5(%arg0: i32) -> (i32, i32, i32) {
    %c0_i32 = arith.constant 0 : i32
    %c0_i32_0 = arith.constant 0 : i32
    %c0_i32_1 = arith.constant 0 : i32
    %c0_i32_2 = arith.constant 0 : i32
    return %c0_i32, %c0_i32_0, %c0_i32_1 : i32, i32, i32
  }
  func.func @transform_6(%arg0: i32) -> (i32, i32, i32) {
    %c0_i32 = arith.constant 0 : i32
    %c0_i32_0 = arith.constant 0 : i32
    %c0_i32_1 = arith.constant 0 : i32
    %c0_i32_2 = arith.constant 0 : i32
    return %c0_i32, %c0_i32_0, %c0_i32_1 : i32, i32, i32
  }
  func.func @transform_7(%arg0: i32) -> (i32, i32, i32) {
    %c0_i32 = arith.constant 0 : i32
    %c0_i32_0 = arith.constant 0 : i32
    %c0_i32_1 = arith.constant 0 : i32
    %c0_i32_2 = arith.constant 0 : i32
    return %c0_i32, %c0_i32_0, %c0_i32_1 : i32, i32, i32
  }
  func.func @transform_8(%arg0: i32) -> (i32, i32, i32) {
    %c0_i32 = arith.constant 0 : i32
    %c0_i32_0 = arith.constant 0 : i32
    %c0_i32_1 = arith.constant 0 : i32
    %c0_i32_2 = arith.constant 0 : i32
    return %c0_i32, %c0_i32_0, %c0_i32_1 : i32, i32, i32
  }
  func.func @transform_9(%arg0: i32) -> (i32, i32, i32) {
    %c0_i32 = arith.constant 0 : i32
    %c0_i32_0 = arith.constant 0 : i32
    %c0_i32_1 = arith.constant 0 : i32
    %c0_i32_2 = arith.constant 0 : i32
    return %c0_i32, %c0_i32_0, %c0_i32_1 : i32, i32, i32
  }
  func.func @transform_10(%arg0: i32) -> (i32, i32, i32) {
    %c0_i32 = arith.constant 0 : i32
    %c0_i32_0 = arith.constant 0 : i32
    %c0_i32_1 = arith.constant 0 : i32
    %c0_i32_2 = arith.constant 0 : i32
    return %c0_i32, %c0_i32_0, %c0_i32_1 : i32, i32, i32
  }
  func.func @transform_11(%arg0: i32) -> (i32, i32, i32) {
    %c0_i32 = arith.constant 0 : i32
    %c0_i32_0 = arith.constant 0 : i32
    %c0_i32_1 = arith.constant 0 : i32
    %c0_i32_2 = arith.constant 0 : i32
    return %c0_i32, %c0_i32_0, %c0_i32_1 : i32, i32, i32
  }
  func.func @transform_12(%arg0: i32) -> (i32, i32, i32) {
    %c0_i32 = arith.constant 0 : i32
    %c0_i32_0 = arith.constant 0 : i32
    %c0_i32_1 = arith.constant 0 : i32
    %c0_i32_2 = arith.constant 0 : i32
    return %c0_i32, %c0_i32_0, %c0_i32_1 : i32, i32, i32
  }
  func.func @transform_13(%arg0: i32) -> (i32, i32, i32) {
    %c0_i32 = arith.constant 0 : i32
    %c0_i32_0 = arith.constant 0 : i32
    %c0_i32_1 = arith.constant 0 : i32
    %c0_i32_2 = arith.constant 0 : i32
    return %c0_i32, %c0_i32_0, %c0_i32_1 : i32, i32, i32
  }
  func.func @transform_14(%arg0: i32) -> (i32, i32, i32) {
    %c0_i32 = arith.constant 0 : i32
    %c0_i32_0 = arith.constant 0 : i32
    %c0_i32_1 = arith.constant 0 : i32
    %c0_i32_2 = arith.constant 0 : i32
    return %c0_i32, %c0_i32_0, %c0_i32_1 : i32, i32, i32
  }
  func.func @transform_15(%arg0: i32) -> (i32, i32, i32) {
    %c0_i32 = arith.constant 0 : i32
    %c0_i32_0 = arith.constant 0 : i32
    %c0_i32_1 = arith.constant 0 : i32
    %c0_i32_2 = arith.constant 0 : i32
    return %c0_i32, %c0_i32_0, %c0_i32_1 : i32, i32, i32
  }
  func.func @transform_16(%arg0: i32) -> (i32, i32, i32) {
    %c0_i32 = arith.constant 0 : i32
    %c0_i32_0 = arith.constant 0 : i32
    %c0_i32_1 = arith.constant 0 : i32
    %c0_i32_2 = arith.constant 0 : i32
    return %c0_i32, %c0_i32_0, %c0_i32_1 : i32, i32, i32
  }
  func.func @transform_17(%arg0: i32) -> (i32, i32) {
    %c0_i32 = arith.constant 0 : i32
    %c0_i32_0 = arith.constant 0 : i32
    %c0_i32_1 = arith.constant 0 : i32
    return %c0_i32, %c0_i32_0 : i32, i32
  }
  func.func @transform_18(%arg0: i32) -> (i32, i32) {
    %c0_i32 = arith.constant 0 : i32
    %c0_i32_0 = arith.constant 0 : i32
    %c0_i32_1 = arith.constant 0 : i32
    return %c0_i32, %c0_i32_0 : i32, i32
  }
  func.func @transform_19(%arg0: i32) -> (i32, i32) {
    %c0_i32 = arith.constant 0 : i32
    %c0_i32_0 = arith.constant 0 : i32
    %c0_i32_1 = arith.constant 0 : i32
    return %c0_i32, %c0_i32_0 : i32, i32
  }
  func.func @transform_20(%arg0: i32) -> (i32, i32) {
    %c0_i32 = arith.constant 0 : i32
    %c0_i32_0 = arith.constant 0 : i32
    %c0_i32_1 = arith.constant 0 : i32
    return %c0_i32, %c0_i32_0 : i32, i32
  }
  func.func @transform_21(%arg0: i32) -> (i32, i32) {
    %c0_i32 = arith.constant 0 : i32
    %c0_i32_0 = arith.constant 0 : i32
    %c0_i32_1 = arith.constant 0 : i32
    return %c0_i32, %c0_i32_0 : i32, i32
  }
  func.func @transform_22(%arg0: i32) -> (i32, i32) {
    %c0_i32 = arith.constant 0 : i32
    %c0_i32_0 = arith.constant 0 : i32
    %c0_i32_1 = arith.constant 0 : i32
    return %c0_i32, %c0_i32_0 : i32, i32
  }
  func.func @transform_23(%arg0: i32) -> (i32, i32, i32) {
    %c0_i32 = arith.constant 0 : i32
    %c0_i32_0 = arith.constant 0 : i32
    %c0_i32_1 = arith.constant 0 : i32
    return %arg0, %c0_i32, %c0_i32_0 : i32, i32, i32
  }
}

</mosaic_0001>

<bundles_post_ra>
// kernel: vit_finetune_forward.1
= control target key start
LH: loop header
LB: loop body
LE: loop exit
PB: predicated region body
PF: predicated region fallthrough
CT: control target
= control target key end

     0   :  { %s5922_s0 = inlined_call_operand.vmem [shape: f32[2,5,768], index: 0, kind: input, shape index: {}]   ;;  %s5923_s1 = inlined_call_operand.vmem [shape: f32[768,32], index: 1, kind: input, shape index: {}]   ;;  %s5924_s2 = inlined_call_operand.vmem [shape: f32[1,32], index: 2, kind: input, shape index: {}]   ;;  %s5925_s3 = inlined_call_operand.vmem [shape: f32[1,32], index: 3, kind: input, shape index: {}]   ;;  %s5926_s4 = inlined_call_operand.vmem [shape: f32[5,32], index: 4, kind: input, shape index: {}]   ;;  %s5927_s5 = inlined_call_operand.vmem [shape: f32[2,1,32], index: 5, kind: input, shape index: {}]   ;;  %s5928_s6 = inlined_call_operand.vmem [shape: f32[2,1,32], index: 6, kind: input, shape index: {}]   ;;  %s5929_s7 = inlined_call_operand.vmem [shape: f32[2,32,96], index: 7, kind: input, shape index: {}]   ;;  %s5930_s8 = inlined_call_operand.vmem [shape: f32[2,1,96], index: 8, kind: input, shape index: {}]   ;;  %s5931_s9 = inlined_call_operand.vmem [shape: f32[2,32,32], index: 9, kind: input, shape index: {}]   ;;  %s5932_s10 = inlined_call_operand.vmem [shape: f32[2,1,32], index: 10, kind: input, shape index: {}]   ;;  %s5933_s11 = inlined_call_operand.vmem [shape: f32[2,1,32], index: 11, kind: input, shape index: {}]   ;;  %s5934_s12 = inlined_call_operand.vmem [shape: f32[2,1,32], index: 12, kind: input, shape index: {}]   ;;  %s5935_s13 = inlined_call_operand.vmem [shape: f32[2,32,128], index: 13, kind: input, shape index: {}]   ;;  %s5936_s14 = inlined_call_operand.vmem [shape: f32[2,1,128], index: 14, kind: input, shape index: {}]   ;;  %s5937_s15 = inlined_call_operand.vmem [shape: f32[2,128,32], index: 15, kind: input, shape index: {}]   ;;  %s5938_s16 = inlined_call_operand.vmem [shape: f32[2,1,32], index: 16, kind: input, shape index: {}]   ;;  %s5939_s17 = inlined_call_operand.vmem [shape: f32[1,32], index: 17, kind: input, shape index: {}]   ;;  %s5940_s18 = inlined_call_operand.vmem [shape: f32[1,32], index: 18, kind: input, shape index: {}]   ;;  %s5941_s19 = inlined_call_operand.vmem [shape: f32[32,48], index: 19, kind: input, shape index: {}]   ;;  %s5942_s20 = inlined_call_operand.vmem [shape: f32[1,48], index: 20, kind: input, shape index: {}]   ;;  %s5943_s21 = inlined_call_operand.vmem [shape: f32[48,8], index: 21, kind: input, shape index: {}]   ;;  %s5944_s22 = inlined_call_operand.vmem [shape: f32[1,8], index: 22, kind: input, shape index: {}]   ;;  %s5945_s23 = inlined_call_operand.hbm [shape: f32[2,1,8], index: 23, kind: output, shape index: {}]  }
   0x1   :  { %5969 = sst [smem:[#allocation11_spill]] %s5922_s0 }
   0x2   :  { %5970 = sst [smem:[#allocation12_spill]] %s5923_s1 }
   0x3   :  { %5971 = sst [smem:[#allocation13_spill]] %s5924_s2 }
   0x4   :  { %5972 = sst [smem:[#allocation14_spill]] %s5925_s3 }
   0x5   :  { %5973 = sst [smem:[#allocation15_spill]] %s5926_s4 }
   0x6   :  { %5974 = sst [smem:[#allocation16_spill]] %s5927_s5 }
   0x7   :  { %5975 = sst [smem:[#allocation17_spill]] %s5928_s6 }
   0x8   :  { %5976 = sst [smem:[#allocation18_spill]] %s5929_s7 }
   0x9   :  { %5977 = sst [smem:[#allocation19_spill]] %s5944_s22 }
   0xa   :  { %5978 = sst [smem:[#allocation20_spill]] %s5945_s23 }
   0xb   :  { %28 = vsyncpa [#allocation3], 0 }
   0xc   :  { %30 = vsyncpa [#allocation3 + $0x1], 0  ;;  %s4996_s4 = smov 0   ;;  %s4998_s30 = smov 0  }
   0xd   :  { %s5000_s24 = smov 0   ;;  %s5002_s25 = smov 0  }
   0xe LB: > { %5979 = sst [smem:[#allocation5_spill]] %s4847_s4  ;;  %s5017_s5 = sadd.s32 4294967295, %s4859_s25   ;;  %s4859_s25 = sphi %s5002_s25, %s6010_s25   ;;  %s4855_s24 = sphi %s5000_s24, %s6012_s24   ;;  %s4851_s30 = sphi %s4998_s30, %s6014_s30   ;;  %s4847_s4 = sphi %s4996_s4, %s6013_s4  }
   0xf   : > { %5980 = sst [smem:[#allocation6_spill]] %s4855_s24  ;;  %s3925_s1 = sadd.s32 4294967294, %s4859_s25  }
  0x10   : > { %5981 = sst [smem:[#allocation7_spill]] %s4859_s25  ;;  %s5021_s26 = sadd.s32 1, %s4859_s25  }
  0x11   : > { %5982 = sst [smem:[#allocation8_spill]] %s5021_s26  ;;  %s531_s2 = sadd.s32 1, %s4855_s24 }
  0x12   : > { %s528_s6 = ssub.s32 %s4859_s25, %s5021_s26  ;;  %p541_p0 = scmp.ne.s32.totalorder %s4855_s24, %s4851_s30 }
  0x13   : > { %p529_p1 = scmp.eq.s32.totalorder %s528_s6, 0  ;;  %p542_p2 = scmp.eq.s32.totalorder %s5017_s5, 1 }
  0x14   : > { %p547_p3 = scmp.ne.s32.totalorder %s4851_s30, %s4847_s4  ;;  %p548_p4 = scmp.eq.s32.totalorder %s3925_s1, 1 }
  0x15   : > { %s5032_s27 = scalar_select %p529_p1, %s4855_s24, %s531_s2  }
  0x16   : > { %p5034_p5 = por %p542_p2, %p541_p0  ;;  %p5038_p6 = por %p548_p4, %p547_p3 }
  0x17   : > { %5983 = sst [smem:[#allocation9_spill]] %s5032_s27  ;;  %p3928_p7 = scmp.ge.s32.totalorder %s4859_s25, 1 }
  0x18   : > { %s5985_s28 = scalar_select %p5038_p6, 1, 0 }
  0x19   : > { %p640_p8 = scmp.lt.s32.totalorder %s4859_s25, 3 }
  0x1a   : > { %5986 = sst [smem:[#allocation10_spill]] %s5985_s28 }
  0x1b   : > { %p641_p9 = pnand %p3928_p7, %p640_p8 }
  0x1c   : > { %s5987_s0 = sld [smem:[#allocation12_spill]] (!%p641_p9)  ;;  %p703_p10 = scmp.lt.s32.totalorder (!%p641_p9), %s5017_s5, 1  ;;  %vm1042_vm1 = vcmask (!%p641_p9), 258048   ;;  %vm4862_vm2 = vmmov (!%p641_p9), 0   ;;  %vm1082_vm3 = vcmask (!%p641_p9), 261120   ;;  %vm1163_vm4 = vcmask (!%p641_p9), 64512  }
  0x1d   : > { %644 = sbr.rel (%p641_p9) target bundleno = 8913 (0x22d1), region = 112  ;;  %s5988_s29 = sld [smem:[#allocation11_spill]] (!%p641_p9)  ;;  %vm1257_vm5 = vcmask (!%p641_p9), 1044480   ;;  %vm1239_vm6 = vcmask (!%p641_p9), 36864   ;;  %vm1253_vm7 = vcmask (!%p641_p9), 39936   ;;  %vm3781_vm8 = vcmask (!%p641_p9), 392192  }
  0x1e   : > { %s5989_s1 = sld [smem:[#allocation13_spill]] (!%p641_p9)  ;;  %s5990_s4 = sld [smem:[#allocation14_spill]] (!%p641_p9)  ;;  %vm3855_vm9 = vcmask (!%p641_p9), 57344  }
  0x1f   : > { %s5991_s25 = sld [smem:[#allocation15_spill]] (!%p641_p9)  ;;  %s5994_s2 = sld [smem:[#allocation17_spill]] (!%p641_p9) }
  0x20   : > { %s4864_s6 = smov (!%p641_p9), 64   ;;  %s5959_s26 = smov (!%p641_p9), 80  }
  0x21   : > { %s5960_s28 = smov (!%p641_p9), 112   ;;  %s5958_s22 = smov (!%p641_p9), 48  }
  0x22   : > { %v730_v0 = vld [vmem:[%s5987_s0 + $0x80] sm:$0xff] (!%p641_p9)  ;;  %v731_v1 = vld [vmem:[%s5987_s0 + $0x88] sm:$0xff] (!%p641_p9)  ;;  %v732_v11 = vld [vmem:[%s5987_s0 + $0x90] sm:$0xff] (!%p641_p9)  ;;  %s5962_s23 = smov (!%p641_p9), 72  }
  0x23   : > { %v714_v2 = vld [vmem:[%s5987_s0] sm:$0xff] (!%p641_p9)  ;;  %v4514_v3 = vpack.c.bf16 (!%p641_p9), %v731_v1, %v730_v0  ;;  %v715_v4 = vld [vmem:[%s5987_s0 + $0x8] sm:$0xff] (!%p641_p9)  ;;  %v733_v13 = vld [vmem:[%s5987_s0 + $0x98] sm:$0xff] (!%p641_p9) }
  0x24   : > { %v762_v5 = vld [vmem:[%s5987_s0 + $0x180] sm:$0xff]  ;;  %v763_v6 = vld [vmem:[%s5987_s0 + $0x188] sm:$0xff]  ;;  %v4516_v7 = vpack.c.bf16 %v715_v4, %v714_v2  ;;  %v716_v14 = vld [vmem:[%s5987_s0 + $0x10] sm:$0xff]  ;;  %v4518_v16 = vpack.c.bf16 %v733_v13, %v732_v11  ;;  %s5138_s24 = scalar_select %p703_p10, %s5017_s5, 1 }
  0x25   : > { %v4546_v8 = vpack.c.bf16 %v763_v6, %v762_v5  ;;  %v746_v9 = vld [vmem:[%s5987_s0 + $0x100] sm:$0xff]  ;;  %v747_v10 = vld [vmem:[%s5987_s0 + $0x108] sm:$0xff]  ;;  %4515 = vmatprep.subr.bf16.mxu0 %v4514_v3  ;;  %v717_v15 = vld [vmem:[%s5987_s0 + $0x18] sm:$0xff] }
  0x26   : > { %v4548_v12 = vpack.c.bf16 %v747_v10, %v746_v9  ;;  %4517 = vmatpush3.bf16.msra.mxu0 %v4516_v7  ;;  %v4520_v17 = vpack.c.bf16 %v717_v15, %v716_v14  ;;  %v764_v18 = vld [vmem:[%s5987_s0 + $0x190] sm:$0xff]  ;;  %v765_v19 = vld [vmem:[%s5987_s0 + $0x198] sm:$0xff]  ;;  %v734_v23 = vld [vmem:[%s5987_s0 + $0xa0] sm:$0xff]  ;;  %s4697_s27 = smul.u32 48, %s5138_s24  ;;  %s5957_s24 = smov 104  }
  0x27   : > { %4547 = vmatprep.subr.bf16.mxu1 %v4546_v8  ;;  %v748_v20 = vld [vmem:[%s5987_s0 + $0x110] sm:$0xff]  ;;  %v4550_v21 = vpack.c.bf16 %v765_v19, %v764_v18  ;;  %v749_v22 = vld [vmem:[%s5987_s0 + $0x118] sm:$0xff]  ;;  %v735_v24 = vld [vmem:[%s5987_s0 + $0xa8] sm:$0xff]  ;;  %4519 = vmatprep.subr.bf16.mxu0 %v4518_v16 }
  0x28   : > { %4549 = vmatpush3.bf16.msra.mxu1 %v4548_v12  ;;  %v4552_v25 = vpack.c.bf16 %v749_v22, %v748_v20  ;;  %v4522_v26 = vpack.c.bf16 %v735_v24, %v734_v23  ;;  %v718_v27 = vld [vmem:[%s5987_s0 + $0x20] sm:$0xff]  ;;  %v719_v28 = vld [vmem:[%s5987_s0 + $0x28] sm:$0xff]  ;;  %v736_v35 = vld [vmem:[%s5987_s0 + $0xb0] sm:$0xff]  ;;  %s5195_s3 = scalar_lea.vmem %s5988_s29, %s4697_s27  ;;  %s5992_s29 = sld [smem:[#allocation18_spill]] }
  0x29   : > { %v766_v29 = vld [vmem:[%s5987_s0 + $0x1a0] sm:$0xff]  ;;  %4551 = vmatprep.subr.bf16.mxu1 %v4550_v21  ;;  %v767_v30 = vld [vmem:[%s5987_s0 + $0x1a8] sm:$0xff]  ;;  %v4524_v33 = vpack.c.bf16 %v719_v28, %v718_v27  ;;  %v737_v36 = vld [vmem:[%s5987_s0 + $0xb8] sm:$0xff]  ;;  %s5993_s27 = sld [smem:[#allocation16_spill]] }
  0x2a   : > { %v750_v31 = vld [vmem:[%s5987_s0 + $0x120] sm:$0xff]  ;;  %v751_v32 = vld [vmem:[%s5987_s0 + $0x128] sm:$0xff]  ;;  %4521 = vmatpush3.bf16.msra.mxu0 %v4520_v17  ;;  %v4554_v34 = vpack.c.bf16 %v767_v30, %v766_v29  ;;  %v720_v37 = vld [vmem:[%s5987_s0 + $0x30] sm:$0xff]  ;;  %v4526_v39 = vpack.c.bf16 %v737_v36, %v736_v35 }
  0x2b   : > { %4523 = vmatprep.subr.bf16.mxu0 %v4522_v26  ;;  %v4556_v38 = vpack.c.bf16 %v751_v32, %v750_v31  ;;  %v721_v40 = vld [vmem:[%s5987_s0 + $0x38] sm:$0xff]  ;;  %v768_v41 = vld [vmem:[%s5987_s0 + $0x1b0] sm:$0xff]  ;;  %v738_v46 = vld [vmem:[%s5987_s0 + $0xc0] sm:$0xff] }
  0x2c   : > { %4553 = vmatpush3.bf16.msra.mxu1 %v4552_v25  ;;  %v769_v42 = vld [vmem:[%s5987_s0 + $0x1b8] sm:$0xff]  ;;  %v752_v44 = vld [vmem:[%s5987_s0 + $0x130] sm:$0xff]  ;;  %v739_v47 = vld [vmem:[%s5987_s0 + $0xc8] sm:$0xff]  ;;  %v4528_v48 = vpack.c.bf16 %v721_v40, %v720_v37 }
  0x2d   : > { %4555 = vmatprep.subr.bf16.mxu1 %v4554_v34  ;;  %v4558_v43 = vpack.c.bf16 %v769_v42, %v768_v41  ;;  %v753_v45 = vld [vmem:[%s5987_s0 + $0x138] sm:$0xff]  ;;  %v770_v49 = vld [vmem:[%s5987_s0 + $0x1c0] sm:$0xff]  ;;  %v771_v50 = vld [vmem:[%s5987_s0 + $0x1c8] sm:$0xff]  ;;  %v4530_v52 = vpack.c.bf16 %v739_v47, %v738_v46 }
  0x2e   : > { %4525 = vmatpush3.bf16.msra.mxu0 %v4524_v33  ;;  %v4560_v51 = vpack.c.bf16 %v753_v45, %v752_v44  ;;  %v722_v53 = vld [vmem:[%s5987_s0 + $0x40] sm:$0xff]  ;;  %v723_v54 = vld [vmem:[%s5987_s0 + $0x48] sm:$0xff]  ;;  %v4562_v56 = vpack.c.bf16 %v771_v50, %v770_v49  ;;  %v740_v58 = vld [vmem:[%s5987_s0 + $0xd0] sm:$0xff] }
  0x2f   : > { %4527 = vmatprep.subr.bf16.mxu0 %v4526_v39  ;;  %v754_v55 = vld [vmem:[%s5987_s0 + $0x140] sm:$0xff]  ;;  %v755_v57 = vld [vmem:[%s5987_s0 + $0x148] sm:$0xff]  ;;  %v741_v59 = vld [vmem:[%s5987_s0 + $0xd8] sm:$0xff]  ;;  %v4532_v62 = vpack.c.bf16 %v723_v54, %v722_v53 }
  0x30   : > { %4557 = vmatpush3.bf16.msra.mxu1 %v4556_v38  ;;  %v772_v60 = vld [vmem:[%s5987_s0 + $0x1d0] sm:$0xff]  ;;  %v773_v61 = vld [vmem:[%s5987_s0 + $0x1d8] sm:$0xff]  ;;  %v4564_v63 = vpack.c.bf16 %v755_v57, %v754_v55  ;;  %v4534_v0 = vpack.c.bf16 %v741_v59, %v740_v58  ;;  %v742_v6 = vld [vmem:[%s5987_s0 + $0xe0] sm:$0xff] }
  0x31   : > { %4559 = vmatprep.subr.bf16.mxu1 %v4558_v43  ;;  %v724_v1 = vld [vmem:[%s5987_s0 + $0x50] sm:$0xff]  ;;  %v725_v2 = vld [vmem:[%s5987_s0 + $0x58] sm:$0xff]  ;;  %v4566_v4 = vpack.c.bf16 %v773_v61, %v772_v60  ;;  %v743_v7 = vld [vmem:[%s5987_s0 + $0xe8] sm:$0xff] }
  0x32   : > { %4529 = vmatpush3.bf16.msra.mxu0 %v4528_v48  ;;  %v756_v3 = vld [vmem:[%s5987_s0 + $0x150] sm:$0xff]  ;;  %v757_v5 = vld [vmem:[%s5987_s0 + $0x158] sm:$0xff]  ;;  %v774_v8 = vld [vmem:[%s5987_s0 + $0x1e0] sm:$0xff]  ;;  %v4536_v10 = vpack.c.bf16 %v725_v2, %v724_v1  ;;  %v4538_v14 = vpack.c.bf16 %v743_v7, %v742_v6 }
  0x33   : > { %4531 = vmatprep.subr.bf16.mxu0 %v4530_v52  ;;  %v775_v9 = vld [vmem:[%s5987_s0 + $0x1e8] sm:$0xff]  ;;  %v726_v11 = vld [vmem:[%s5987_s0 + $0x60] sm:$0xff]  ;;  %v4568_v13 = vpack.c.bf16 %v757_v5, %v756_v3  ;;  %v744_v19 = vld [vmem:[%s5987_s0 + $0xf0] sm:$0xff] }
  0x34   : > { %4561 = vmatpush3.bf16.msra.mxu1 %v4560_v51  ;;  %v709_v12 = vld [vmem:[%s5195_s3 + $0x8] sm:$0x1f]  ;;  %v758_v16 = vld [vmem:[%s5987_s0 + $0x160] sm:$0xff]  ;;  %v4570_v18 = vpack.c.bf16 %v775_v9, %v774_v8  ;;  %v745_v20 = vld [vmem:[%s5987_s0 + $0xf8] sm:$0xff] }
  0x35   : > { %4563 = vmatprep.subr.bf16.mxu1 %v4562_v56  ;;  %v727_v15 = vld [vmem:[%s5987_s0 + $0x68] sm:$0xff]  ;;  %881 = vmatprep.mubr.f32.mxu0 %v709_v12  ;;  %v711_v21 = vld [vmem:[%s5195_s3 + $0x18] sm:$0x1f]  ;;  %v776_v22 = vld [vmem:[%s5987_s0 + $0x1f0] sm:$0xff]  ;;  %v4542_v26 = vpack.c.bf16 %v745_v20, %v744_v19 }
  0x36   : > { %4533 = vmatpush3.bf16.msra.mxu0 %v4532_v62  ;;  %v759_v17 = vld [vmem:[%s5987_s0 + $0x168] sm:$0xff]  ;;  %v777_v23 = vld [vmem:[%s5987_s0 + $0x1f8] sm:$0xff]  ;;  %951 = vmatprep.mubr.f32.mxu1 %v711_v21  ;;  %v4540_v24 = vpack.c.bf16 %v727_v15, %v726_v11  ;;  %v728_v27 = vld [vmem:[%s5987_s0 + $0x70] sm:$0xff] }
  0x37   : > { %4535 = vmatprep.subr.bf16.mxu0 %v4534_v0  ;;  %v4572_v25 = vpack.c.bf16 %v759_v17, %v758_v16  ;;  %v729_v28 = vld [vmem:[%s5987_s0 + $0x78] sm:$0xff]  ;;  %v760_v29 = vld [vmem:[%s5987_s0 + $0x170] sm:$0xff]  ;;  %v4574_v30 = vpack.c.bf16 %v777_v23, %v776_v22  ;;  %v794_v32 = vld [vmem:[%s5987_s0 + $0x280] sm:$0xff] }
  0x38   : > { %4565 = vmatpush3.bf16.msra.mxu1 %v4564_v63  ;;  %v761_v31 = vld [vmem:[%s5987_s0 + $0x178] sm:$0xff]  ;;  %v795_v33 = vld [vmem:[%s5987_s0 + $0x288] sm:$0xff]  ;;  %v4544_v34 = vpack.c.bf16 %v729_v28, %v728_v27  ;;  %v778_v37 = vld [vmem:[%s5987_s0 + $0x200] sm:$0xff] }
  0x39   : > { %4567 = vmatprep.subr.bf16.mxu1 %v4566_v4  ;;  %v4576_v35 = vpack.c.bf16 %v761_v31, %v760_v29  ;;  %v4578_v36 = vpack.c.bf16 %v795_v33, %v794_v32  ;;  %v779_v38 = vld [vmem:[%s5987_s0 + $0x208] sm:$0xff]  ;;  %v796_v39 = vld [vmem:[%s5987_s0 + $0x290] sm:$0xff]  ;;  %v797_v40 = vld [vmem:[%s5987_s0 + $0x298] sm:$0xff]  ;;  %v1027_v31 = vlaneseq }
  0x3a   : > { %4537 = vmatpush3.bf16.msra.mxu0 %v4536_v10  ;;  %v708_v41 = vld [vmem:[%s5195_s3] sm:$0x1f]  ;;  %v4580_v42 = vpack.c.bf16 %v779_v38, %v778_v37  ;;  %v710_v43 = vld [vmem:[%s5195_s3 + $0x10] sm:$0x1f]  ;;  %v4582_v44 = vpack.c.bf16 %v797_v40, %v796_v39  ;;  %v781_v46 = vld [vmem:[%s5987_s0 + $0x218] sm:$0xff] }
  0x3b   : > { %4539 = vmatprep.subr.bf16.mxu0 %v4538_v14  ;;  %v780_v45 = vld [vmem:[%s5987_s0 + $0x210] sm:$0xff]  ;;  %v798_v47 = vld [vmem:[%s5987_s0 + $0x2a0] sm:$0xff]  ;;  %v799_v48 = vld [vmem:[%s5987_s0 + $0x2a8] sm:$0xff]  ;;  %v1028_v32 = vshrl.u32 %v1027_v31, 7 }
  0x3c   : > { %4569 = vmatpush3.bf16.msra.mxu1 %v4568_v13  ;;  %v713_v49 = vld [vmem:[%s5195_s3 + $0x28] sm:$0x1f]  ;;  %v4584_v50 = vpack.c.bf16 %v781_v46, %v780_v45  ;;  %v4586_v51 = vpack.c.bf16 %v799_v48, %v798_v47  ;;  %v782_v52 = vld [vmem:[%s5987_s0 + $0x220] sm:$0xff]  ;;  %v800_v54 = vld [vmem:[%s5987_s0 + $0x2b0] sm:$0xff] }
  0x3d   : > { %4571 = vmatprep.subr.bf16.mxu1 %v4570_v18  ;;  %v783_v53 = vld [vmem:[%s5987_s0 + $0x228] sm:$0xff]  ;;  %v801_v55 = vld [vmem:[%s5987_s0 + $0x2b8] sm:$0xff]  ;;  %v784_v58 = vld [vmem:[%s5987_s0 + $0x230] sm:$0xff]  ;;  %vm1029_vm0 = vcmp.eq.s32.totalorder %v1028_v32, 0 }
  0x3e   : > { %4541 = vmatpush3.bf16.msra.mxu0 %v4540_v24  ;;  %v4588_v56 = vpack.c.bf16 %v783_v53, %v782_v52  ;;  %v4590_v57 = vpack.c.bf16 %v801_v55, %v800_v54  ;;  %v785_v59 = vld [vmem:[%s5987_s0 + $0x238] sm:$0xff]  ;;  %v802_v60 = vld [vmem:[%s5987_s0 + $0x2c0] sm:$0xff]  ;;  %v803_v61 = vld [vmem:[%s5987_s0 + $0x2c8] sm:$0xff]  ;;  %v4863_v54 = vmov 0.0  }
  0x3f   : > { %4543 = vmatprep.subr.bf16.mxu0 %v4542_v26  ;;  %v4592_v62 = vpack.c.bf16 %v785_v59, %v784_v58  ;;  %v4594_v63 = vpack.c.bf16 %v803_v61, %v802_v60  ;;  %v786_v0 = vld [vmem:[%s5987_s0 + $0x240] sm:$0xff]  ;;  %v787_v1 = vld [vmem:[%s5987_s0 + $0x248] sm:$0xff]  ;;  %v804_v2 = vld [vmem:[%s5987_s0 + $0x2d0] sm:$0xff] }
  0x40   : > { %4573 = vmatpush3.bf16.msra.mxu1 %v4572_v25  ;;  %v805_v3 = vld [vmem:[%s5987_s0 + $0x2d8] sm:$0xff]  ;;  %v4596_v4 = vpack.c.bf16 %v787_v1, %v786_v0  ;;  %v788_v6 = vld [vmem:[%s5987_s0 + $0x250] sm:$0xff]  ;;  %v806_v8 = vld [vmem:[%s5987_s0 + $0x2e0] sm:$0xff] }
  0x41   : > { %4575 = vmatprep.subr.bf16.mxu1 %v4574_v30  ;;  %v4598_v5 = vpack.c.bf16 %v805_v3, %v804_v2  ;;  %v789_v7 = vld [vmem:[%s5987_s0 + $0x258] sm:$0xff]  ;;  %v807_v9 = vld [vmem:[%s5987_s0 + $0x2e8] sm:$0xff]  ;;  %v790_v12 = vld [vmem:[%s5987_s0 + $0x260] sm:$0xff] }
  0x42   : > { %4545 = vmatpush3.bf16.msra.mxu0 %v4544_v34  ;;  %v4600_v10 = vpack.c.bf16 %v789_v7, %v788_v6  ;;  %v4602_v11 = vpack.c.bf16 %v807_v9, %v806_v8  ;;  %v791_v13 = vld [vmem:[%s5987_s0 + $0x268] sm:$0xff]  ;;  %v808_v14 = vld [vmem:[%s5987_s0 + $0x2f0] sm:$0xff]  ;;  %v809_v15 = vld [vmem:[%s5987_s0 + $0x2f8] sm:$0xff] }
  0x43   : > { %4579 = vmatprep.subr.bf16.mxu0 %v4578_v36  ;;  %v4604_v16 = vpack.c.bf16 %v791_v13, %v790_v12  ;;  %v4606_v17 = vpack.c.bf16 %v809_v15, %v808_v14  ;;  %v792_v18 = vld [vmem:[%s5987_s0 + $0x270] sm:$0xff]  ;;  %v793_v19 = vld [vmem:[%s5987_s0 + $0x278] sm:$0xff]  ;;  %v712_v21 = vld [vmem:[%s5195_s3 + $0x20] sm:$0x1f]  ;;  %s5964_s3 = smov 88  }
  0x44   : > { %4577 = vmatpush3.bf16.msra.mxu1 %v4576_v35  ;;  %v4608_v20 = vpack.c.bf16 %v793_v19, %v792_v18  ;;  %v3930_v23 = vld [vmem:[%s5989_s1] ss:$0 sm:$0xff]  ;;  %v1072_v48 = vld [vmem:[%s5992_s29 + $0x8] sm:$0xff]  ;;  %v1074_v52 = vld [vmem:[%s5992_s29 + $0x18] sm:$0xff]  ;;  %s5966_s1 = smov 96  }
  0x45   : > { %882 = vmatmul.mubr.f32.vlgmr.msra.gmra.mrb[0].mxu0 %v708_v41  ;;  %v3931_v36 = vld [vmem:[%s5990_s4] ss:$0 sm:$0xff]  ;;  %s5965_s4 = smov 120  }
  0x46   : > { %4581 = vmatpush3.bf16.msra.mxu0 %v4580_v42  ;;  %1021 = vmatprep.mubr.f32.mxu0 %v713_v49  ;;  %v1038_v38 = vld [vmem:[%s5991_s25] sm:$0x1f]  ;;  %s5963_s25 = smov 56  }
  0x47   : > { %952 = vmatmul.mubr.f32.vlgmr.msra.gmra.mrb[0].mxu1 %v710_v43  ;;  %4583 = vmatprep.subr.bf16.mxu0 %v4582_v44  ;;  %v1071_v47 = vld [vmem:[%s5992_s29] sm:$0xff] }
  0x48   : > { %v4611_v49 = vpack.c.bf16 %v1072_v48, %v1071_v47  ;;  %4262 = vmatprep.mubr.msk.f32.mxu1 %vm4862_vm2, %v4863_v54  ;;  %v3932_v59 = vld [vmem:[%s5993_s27] ss:$0 sm:$0xff]  ;;  %v1157_v47 = vld [vmem:[%s5931_s9 + $0x8] sm:$0xff] }
  0x49   : > { %v3933_v61 = vld [vmem:[%s5994_s2] ss:$0 sm:$0xff] }
  0x4a   : > { %4585 = vmatpush3.bf16.msra.mxu0 %v4584_v50  ;;  %v4861_v50 = vmov 0.0|0.0   ;;  %v3934_v0 = vld [vmem:[%s5930_s8] ss:$0 sm:$0xff] }
  0x4b   : > { %4587 = vmatprep.subr.bf16.mxu0 %v4586_v51  ;;  %4610 = vmatprep.subr.bf16.mxu1 %v4861_v50  ;;  %v1073_v51 = vld [vmem:[%s5992_s29 + $0x10] sm:$0xff] }
  0x4c   : > { %4612 = vmatpush3.bf16.msra.mxu1 %v4611_v49  ;;  %v4614_v53 = vpack.c.bf16 %v1074_v52, %v1073_v51  ;;  %v1156_v49 = vld [vmem:[%s5931_s9] sm:$0xff] }
  0x4d   : > { %4613 = vmatprep.subr.bf16.mxu1 %v4861_v50 }
  0x4e   : > { %4589 = vmatpush3.bf16.msra.mxu0 %v4588_v56 }
  0x4f   : > { %4591 = vmatprep.subr.bf16.mxu0 %v4590_v57 }
  0x50   : > { %4615 = vmatpush3.bf16.msra.mxu1 %v4614_v53 }
  0x51   : > { %4265 = vmatprep.subr.mxu1 %v4863_v54 }
  0x52   : > { %4593 = vmatpush3.bf16.msra.mxu0 %v4592_v62 }
  0x53   : > { %4595 = vmatprep.subr.bf16.mxu0 %v4594_v63 }
  0x56   : > { %4597 = vmatpush3.bf16.msra.mxu0 %v4596_v4 }
  0x57   : > { %4599 = vmatprep.subr.bf16.mxu0 %v4598_v5 }
  0x5a   : > { %4601 = vmatpush3.bf16.msra.mxu0 %v4600_v10 }
  0x5b   : > { %4603 = vmatprep.subr.bf16.mxu0 %v4602_v11 }
  0x5e   : > { %4605 = vmatpush3.bf16.msra.mxu0 %v4604_v16 }
  0x5f   : > { %4607 = vmatprep.subr.bf16.mxu0 %v4606_v17 }
  0x62   : > { %4609 = vmatpush3.bf16.msra.mxu0 %v4608_v20 }
  0x63   : > { %4295 = vmatprep.subr.mxu0 %v4863_v54 }
  0x65   : > { %1022 = vmatmul.mubr.f32.vlgmr.msra.gmra.mrb[2].mxu0 %v712_v21 }
  0x66   : > { %4297 = vmatprep.mubr.msk.f32.mxu0 %vm4862_vm2, %v4863_v54 }
 0x118   : > { %v4067_v22 = vpop.f32.mrb[0].mxu0 }
 0x119   : > { %v4068_v24 = vpop.f32.mrb[1].mxu0 }
 0x11a   : > { %v4102_v25 = vpop.f32.mrb[0].mxu1  ;;  %v4069_v26 = vadd.f32 %v4068_v24, %v4067_v22 }
 0x11b   : > { %v4103_v27 = vpop.f32.mrb[1].mxu1 }
 0x11c   : > { %v4104_v28 = vadd.f32 %v4103_v27, %v4102_v25  ;;  %v884_v29 = vadd.f32 %v4069_v26, %v3930_v23 }
 0x11e   : > { %v954_v30 = vadd.f32 %v4104_v28, %v884_v29 }
 0x138   : > { %v4137_v33 = vpop.f32.mrb[2].mxu0 }
 0x139   : > { %v4138_v34 = vpop.f32.mrb[3].mxu0 }
 0x13a   : > { %v4139_v35 = vadd.f32 %v4138_v34, %v4137_v33 }
 0x13c   : > { %v1024_v37 = vadd.f32 %v4139_v35, %v954_v30 }
 0x13e   : > { %v1037_v39 = vsel %vm1029_vm0, %v3931_v36, %v1024_v37 }
 0x13f   : > { %v5359_v40 = vadd.f32 %v1038_v38, %v1037_v39 }
 0x141   : > { %v1043_v41 = vsel %vm1042_vm1, %v5359_v40, 0.0 }
 0x142   : > { %1044 = vadd.xlane.f32.xlu0 %v1043_v41 }
 0x1cf   : > { %v1045_v42 = vpop.xlane.xlu0 %1044 }
 0x1d0   : > { %v1047_v43 = vmul.f32 0.03125, %v1045_v42 }
 0x1d2   : > { %v1048_v44 = vsub.f32 %v5359_v40, %v1047_v43 }
 0x1d4   : > { %v1049_v45 = vmul.f32 %v1048_v44, %v1048_v44 }
 0x1d6   : > { %v1050_v46 = vsel %vm1042_vm1, %v1049_v45, 0.0 }
 0x1d7   : > { %1051 = vadd.xlane.f32.xlu0 %v1050_v46 }
 0x264   : > { %v1052_v55 = vpop.xlane.xlu0 %1051 }
 0x265   : > { %v1053_v56 = vmul.f32 0.03125, %v1052_v55 }
 0x267   : > { %v1054_v57 = vadd.f32 1e-06, %v1053_v56 }
 0x269   : > { %4751 = vrsqrt.f32 %v1054_v57 }
 0x273   : > { %v4752_v58 = vpop.eup %4751 }
 0x274   : > { %v1056_v60 = vmul.f32 %v4752_v58, %v1048_v44 }
 0x276   : > { %v1063_v62 = vmul.f32 %v3932_v59, %v1056_v60  ;;  %v1158_v59 = vld [vmem:[%s5931_s9 + $0x10] sm:$0xff] }
 0x278   : > { %v1070_v63 = vadd.f32 %v3933_v61, %v1063_v62 }
 0x27a   : > { %4263 = vmatmul.mubr.msk.f32.vlgmr.msra.gmra.mrb[2].mxu1 %vm1082_vm3, %v1070_v63 }
 0x27b   : > { %4267 = vmatprep.mubr.msk.f32.mxu1 %vm4862_vm2, %v4863_v54 }
 0x34d   : > { %v1152_v1 = vpop.f32.mrb[2].mxu1 }
 0x34e   : > { %v5397_v2 = vadd.f32 %v3934_v0, %v1152_v1  ;;  %v4264_v3 = vpop.f32.mrb[3].mxu1 }
 0x350   : > { %1251 = vrot.lane.b32.xlu0 %v5397_v2, %s4864_s6  ;;  %1161 = vrot.lane.b32.xlu1 %v5397_v2, %s5966_s1  ;;  %s5999_s1 = smov 112  }
 0x354   : > { %1332 = vrot.lane.b32.xlu0 %v5397_v2, %s5964_s3  ;;  %s6006_s3 = sld [smem:[#allocation20_spill]] }
 0x3c2   : > { %v1162_v4 = vpop.permute.xlu1 %1161  ;;  %v1252_v5 = vpop.permute.xlu0 %1251 }
 0x3c3   : > { %4266 = vmatpush3.xpose.msk.msra.mxu1 %vm1163_vm4, %v1162_v4 }
 0x3c4   : > { %4270 = vmatprep.subr.mxu1 %v4863_v54 }
 0x3c6   : > { %4268 = vmatmul.mubr.msk.f32.vlgmr.msra.gmra.mrb[4].mxu1 %vm1163_vm4, %v5397_v2  ;;  %v1333_v16 = vpop.permute.xlu0 %1332 }
 0x3c7   : > { %4271 = vmatpush3.msk.msra.mxu1 %vm1257_vm5, %v1252_v5  ;;  %4272 = vmatprep.mubr.msk.f32.mxu1 %vm4862_vm2, %v4863_v54 }
 0x3c8   : > { %4275 = vmatprep.subr.mxu1 %v4863_v54 }
 0x499   : > { %v1234_v6 = vpop.f32.mrb[4].mxu1 }
 0x49a   : > { %v1238_v7 = vmul.f32 0.35355338, %v1234_v6  ;;  %v4269_v8 = vpop.f32.mrb[5].mxu1 }
 0x49c   : > { %v1240_v9 = vsel %vm1239_vm6, %v1238_v7, -inf }
 0x49d   : > { %1241 = vmax.xlane.f32.xlu1 %v1240_v9 }
 0x4ae   : > { %1645 = vrot.lane.b32.xlu1 %v5397_v2, %s5959_s26 }
 0x52a   : > { %v1242_v10 = vpop.xlane.xlu1 %1241 }
 0x52b   : > { %v1243_v11 = vsub.f32 %v1238_v7, %v1242_v10 }
 0x52d   : > { %v1244_v12 = vmul.f32 1.442695, %v1243_v11 }
 0x52e   : > { %v1646_v13 = vpop.permute.xlu1 %1645 }
 0x52f   : > { %4753 = vpow2.f32 %v1244_v12  ;;  %4296 = vmatpush3.xpose.msk.msra.mxu0 %vm1163_vm4, %v1646_v13 }
 0x530   : > { %4305 = vmatprep.subr.mxu0 %v4863_v54 }
 0x539   : > { %v4754_v14 = vpop.eup %4753 }
 0x53a   : > { %v1246_v15 = vsel %vm1239_vm6, %v4754_v14, 0.0 }
 0x53b   : > { %1247 = vadd.xlane.f32.xlu0 %v1246_v15 }
 0x551   : > { %1330 = vrot.lane.b32.xlu0 %v5397_v2, %s5965_s4  ;;  %s701_s4 = sand.u32 1, %s4851_s30  }
 0x552   : > { %s702_s26 = scalar_lea.vmem [#allocation2], %s701_s4 }
 0x555   : > { %1643 = vrot.lane.b32.xlu0 %v5397_v2, %s5960_s28  ;;  %s5995_s28 = smov 96  }
 0x5c8   : > { %v1248_v17 = vpop.xlane.xlu0 %1247 }
 0x5c9   : > { %4755 = vrcp.f32 %v1248_v17 }
 0x5cc   : > { %v1331_v18 = vpop.permute.xlu0 %1330 }
 0x5d0   : > { %v1644_v19 = vpop.permute.xlu0 %1643 }
 0x5d1   : > { %4298 = vmatmul.mubr.msk.f32.vlgmr.msra.gmra.mrb[4].mxu0 %vm1163_vm4, %v1644_v19 }
 0x5d2   : > { %4307 = vmatprep.mubr.msk.f32.mxu0 %vm4862_vm2, %v4863_v54  ;;  %4306 = vmatpush3.msra.mxu0 %v1158_v59 }
 0x5d3   : > { %v4756_v20 = vpop.eup %4755  ;;  %4315 = vmatprep.subr.mxu0 %v4863_v54 }
 0x5d4   : > { %v1250_v21 = vmul.f32 %v4756_v20, %v4754_v14  ;;  %v1159_v14 = vld [vmem:[%s5931_s9 + $0x18] sm:$0xff] }
 0x5d6   : > { %4273 = vmatmul.mubr.msk.f32.vlgmr.msra.gmra.mrb[6].mxu1 %vm1253_vm7, %v1250_v21 }
 0x5d7   : > { %4276 = vmatpush3.xpose.msk.msra.mxu1 %vm1163_vm4, %v1333_v16  ;;  %4277 = vmatprep.mubr.msk.f32.mxu1 %vm4862_vm2, %v4863_v54 }
 0x5d8   : > { %4280 = vmatprep.subr.mxu1 %v4863_v54 }
 0x5da   : > { %4278 = vmatmul.mubr.msk.f32.vlgmr.msra.gmra.mrb[8].mxu1 %vm1163_vm4, %v1331_v18 }
 0x5db   : > { %4282 = vmatprep.mubr.msk.f32.mxu1 %vm4862_vm2, %v4863_v54 }
 0x6a4   : > { %v1717_v22 = vpop.f32.mrb[4].mxu0 }
 0x6a5   : > { %v4299_v23 = vpop.f32.mrb[5].mxu0  ;;  %v1721_v35 = vmul.f32 0.35355338, %v1717_v22 }
 0x6a7   : > { %v1722_v37 = vsel %vm1239_vm6, %v1721_v35, -inf }
 0x6a9   : > { %v1326_v24 = vpop.f32.mrb[6].mxu1 }
 0x6aa   : > { %v4274_v25 = vpop.f32.mrb[7].mxu1 }
 0x6ab   : > { %v3956_v25 = vld [vmem:[%s5932_s10] ss:$0 sm:$0xff] }
 0x6ad   : > { %v1404_v26 = vpop.f32.mrb[8].mxu1 }
 0x6ae   : > { %v1408_v27 = vmul.f32 0.35355338, %v1404_v26  ;;  %v4279_v28 = vpop.f32.mrb[9].mxu1 }
 0x6b0   : > { %v1409_v29 = vsel %vm1239_vm6, %v1408_v27, -inf }
 0x6b1   : > { %1410 = vmax.xlane.f32.xlu0 %v1409_v29 }
 0x6c7   : > { %1420 = vrot.lane.b32.xlu0 %v5397_v2, %s5963_s25  ;;  %s5998_s25 = smov 56  }
 0x6cb   : > { %1733 = vrot.lane.b32.xlu0 %v5397_v2, %s5958_s22  ;;  %s5961_s22 = smov 40  }
 0x6cf   : > { %1884 = vrot.lane.b32.xlu0 %v5397_v2, %s5957_s24  ;;  %s5997_s24 = smov 88  }
 0x73e   : > { %v1411_v30 = vpop.xlane.xlu0 %1410 }
 0x73f   : > { %v1412_v31 = vsub.f32 %v1408_v27, %v1411_v30 }
 0x741   : > { %v1413_v32 = vmul.f32 1.442695, %v1412_v31 }
 0x742   : > { %v1421_v33 = vpop.permute.xlu0 %1420 }
 0x743   : > { %4757 = vpow2.f32 %v1413_v32  ;;  %4281 = vmatpush3.msk.msra.mxu1 %vm1257_vm5, %v1421_v33 }
 0x744   : > { %4285 = vmatprep.subr.mxu1 %v4863_v54 }
 0x746   : > { %v1734_v55 = vpop.permute.xlu0 %1733 }
 0x74a   : > { %v1885_v58 = vpop.permute.xlu0 %1884 }
 0x74d   : > { %v4758_v34 = vpop.eup %4757 }
 0x74e   : > { %v1415_v36 = vsel %vm1239_vm6, %v4758_v34, 0.0 }
 0x74f   : > { %1416 = vadd.xlane.f32.xlu1 %v1415_v36  ;;  %v2165_v36 = vld [vmem:[%s5935_s13 + $0x10] sm:$0xff] }
 0x753   : > { %1723 = vmax.xlane.f32.xlu1 %v1722_v37  ;;  %v2166_v37 = vld [vmem:[%s5935_s13 + $0x18] sm:$0xff] }
 0x7dc   : > { %v1417_v38 = vpop.xlane.xlu1 %1416 }
 0x7dd   : > { %4759 = vrcp.f32 %v1417_v38  ;;  %v4620_v38 = vpack.c.bf16 %v2166_v37, %v2165_v36  ;;  %v3968_v37 = vld [vmem:[%s5992_s29 + $0x30] sm:$0xff] }
 0x7e0   : > { %v1724_v39 = vpop.xlane.xlu1 %1723 }
 0x7e1   : > { %v1725_v41 = vsub.f32 %v1721_v35, %v1724_v39  ;;  %v2256_v39 = vld [vmem:[%s5937_s15] sm:$0xff] }
 0x7e3   : > { %v1726_v42 = vmul.f32 1.442695, %v1725_v41  ;;  %v2257_v41 = vld [vmem:[%s5937_s15 + $0x8] sm:$0xff] }
 0x7e5   : > { %4761 = vpow2.f32 %v1726_v42  ;;  %v4623_v42 = vpack.c.bf16 %v2257_v41, %v2256_v39 }
 0x7e7   : > { %v4760_v43 = vpop.eup %4759 }
 0x7e8   : > { %v1419_v44 = vmul.f32 %v4760_v43, %v4758_v34  ;;  %v2163_v34 = vld [vmem:[%s5935_s13] sm:$0xff] }
 0x7ea   : > { %4283 = vmatmul.mubr.msk.f32.vlgmr.msra.gmra.mrb[10].mxu1 %vm1253_vm7, %v1419_v44 }
 0x7eb   : > { %4287 = vmatprep.mubr.msk.f32.mxu1 %vm4862_vm2, %v4863_v54  ;;  %4286 = vmatpush3.msra.mxu1 %v1157_v47  ;;  %v3957_v47 = vld [vmem:[%s5933_s11] ss:$0 sm:$0xff] }
 0x7ec   : > { %4290 = vmatprep.subr.mxu1 %v4863_v54 }
 0x7ef   : > { %v4762_v45 = vpop.eup %4761 }
 0x7f0   : > { %v1728_v46 = vsel %vm1239_vm6, %v4762_v45, 0.0 }
 0x7f1   : > { %1729 = vadd.xlane.f32.xlu1 %v1728_v46 }
 0x802   : > { %1886 = vrot.lane.b32.xlu1 %v5397_v2, %s5962_s23  ;;  %s6000_s23 = smov 80  }
 0x87e   : > { %v1730_v48 = vpop.xlane.xlu1 %1729 }
 0x87f   : > { %4763 = vrcp.f32 %v1730_v48 }
 0x882   : > { %v1887_v57 = vpop.permute.xlu1 %1886 }
 0x889   : > { %v4764_v53 = vpop.eup %4763 }
 0x88a   : > { %v1732_v56 = vmul.f32 %v4764_v53, %v4762_v45  ;;  %v2258_v53 = vld [vmem:[%s5937_s15 + $0x10] sm:$0xff] }
 0x8bd   : > { %v1493_v51 = vpop.f32.mrb[10].mxu1 }
 0x8be   : > { %v4284_v52 = vpop.f32.mrb[11].mxu1  ;;  %4288 = vmatmul.mubr.msk.f32.vlgmr.msra.gmra.mrb[12].mxu1 %vm1163_vm4, %v1493_v51 }
 0x8bf   : > { %4291 = vmatpush3.msra.mxu1 %v1156_v49  ;;  %4292 = vmatprep.mubr.msk.f32.mxu1 %vm4862_vm2, %v4863_v54  ;;  %v3958_v49 = vld [vmem:[%s5934_s12] ss:$0 sm:$0xff] }
 0x8c0   : > { %4300 = vmatprep.subr.mxu1 %v4863_v54 }
 0x8c2   : > { %4293 = vmatmul.mubr.msk.f32.vlgmr.msra.gmra.mrb[14].mxu1 %vm1163_vm4, %v1326_v24 }
 0x8c3   : > { %4301 = vmatpush3.msk.msra.mxu1 %vm1257_vm5, %v1734_v55  ;;  %4302 = vmatprep.mubr.msk.f32.mxu1 %vm4862_vm2, %v4863_v54  ;;  %v2259_v55 = vld [vmem:[%s5937_s15 + $0x18] sm:$0xff] }
 0x8c4   : > { %4310 = vmatprep.subr.mxu1 %v4863_v54 }
 0x8c6   : > { %4303 = vmatmul.mubr.msk.f32.vlgmr.msra.gmra.mrb[16].mxu1 %vm1253_vm7, %v1732_v56  ;;  %v4626_v56 = vpack.c.bf16 %v2259_v55, %v2258_v53 }
 0x8c7   : > { %4312 = vmatprep.mubr.msk.f32.mxu1 %vm4862_vm2, %v4863_v54 }
 0x8ca   : > { %4311 = vmatpush3.xpose.msk.msra.mxu1 %vm1163_vm4, %v1887_v57  ;;  %v2260_v57 = vld [vmem:[%s5937_s15 + $0x20] sm:$0xff] }
 0x8cb   : > { %4320 = vmatprep.subr.mxu1 %v4863_v54 }
 0x8cd   : > { %4313 = vmatmul.mubr.msk.f32.vlgmr.msra.gmra.mrb[18].mxu1 %vm1163_vm4, %v1885_v58  ;;  %v2261_v58 = vld [vmem:[%s5937_s15 + $0x28] sm:$0xff] }
 0x8ce   : > { %4322 = vmatprep.mubr.msk.f32.mxu1 %vm4862_vm2, %v4863_v54  ;;  %4321 = vmatpush3.msra.mxu1 %v1159_v14  ;;  %v4629_v59 = vpack.c.bf16 %v2261_v58, %v2260_v57 }
 0x8cf   : > { %4622 = vmatprep.subr.bf16.mxu1 %v4861_v50 }
 0x991   : > { %v1566_v60 = vpop.f32.mrb[12].mxu1 }
 0x992   : > { %v4289_v61 = vpop.f32.mrb[13].mxu1 }
 0x993   : > { %v2263_v61 = vld [vmem:[%s5937_s15 + $0x38] sm:$0xff] }
 0x995   : > { %v1639_v62 = vpop.f32.mrb[14].mxu1 }
 0x996   : > { %v1640_v63 = vadd.f32 %v1639_v62, %v1566_v60  ;;  %v4294_v0 = vpop.f32.mrb[15].mxu1  ;;  %v2262_v60 = vld [vmem:[%s5937_s15 + $0x30] sm:$0xff] }
 0x997   : > { %v4632_v62 = vpack.c.bf16 %v2263_v61, %v2262_v60  ;;  %v2265_v0 = vld [vmem:[%s5937_s15 + $0x48] sm:$0xff] }
 0x999   : > { %v1806_v1 = vpop.f32.mrb[16].mxu1 }
 0x99a   : > { %v4304_v3 = vpop.f32.mrb[17].mxu1  ;;  %4308 = vmatmul.mubr.msk.f32.vlgmr.msra.gmra.mrb[6].mxu0 %vm1163_vm4, %v1806_v1 }
 0x99b   : > { %4317 = vmatprep.mubr.msk.f32.mxu0 %vm4862_vm2, %v4863_v54  ;;  %v2266_v3 = vld [vmem:[%s5937_s15 + $0x50] sm:$0xff] }
 0x9a0   : > { %v1958_v4 = vpop.f32.mrb[18].mxu1 }
 0x9a1   : > { %v1962_v5 = vmul.f32 0.35355338, %v1958_v4  ;;  %v4314_v6 = vpop.f32.mrb[19].mxu1  ;;  %v2267_v4 = vld [vmem:[%s5937_s15 + $0x58] sm:$0xff] }
 0x9a2   : > { %v2268_v6 = vld [vmem:[%s5937_s15 + $0x60] sm:$0xff] }
 0x9a3   : > { %v1963_v7 = vsel %vm1239_vm6, %v1962_v5, -inf }
 0x9a4   : > { %1964 = vmax.xlane.f32.xlu0 %v1963_v7  ;;  %v2269_v7 = vld [vmem:[%s5937_s15 + $0x68] sm:$0xff] }
 0x9ba   : > { %1974 = vrot.lane.b32.xlu0 %v5397_v2, %s5961_s22  ;;  %s4032_s22 = sshll.u32 %s5017_s5, 4  ;;  %s4875_s5 = smov [#allocation2]  }
 0x9bb   : > { %s5880_s0 = scalar_lea.hbm %s6006_s3, %s4032_s22 }
 0xa31   : > { %v1965_v8 = vpop.xlane.xlu0 %1964 }
 0xa32   : > { %v1966_v9 = vsub.f32 %v1962_v5, %v1965_v8  ;;  %v4638_v5 = vpack.c.bf16 %v2267_v4, %v2266_v3  ;;  %v4641_v8 = vpack.c.bf16 %v2269_v7, %v2268_v6 }
 0xa34   : > { %v1967_v10 = vmul.f32 1.442695, %v1966_v9  ;;  %v2270_v9 = vld [vmem:[%s5937_s15 + $0x70] sm:$0xff] }
 0xa35   : > { %v1975_v11 = vpop.permute.xlu0 %1974 }
 0xa36   : > { %4765 = vpow2.f32 %v1967_v10  ;;  %4316 = vmatpush3.msk.msra.mxu0 %vm1257_vm5, %v1975_v11  ;;  %v2271_v10 = vld [vmem:[%s5937_s15 + $0x78] sm:$0xff] }
 0xa37   : > { %4616 = vmatprep.subr.bf16.mxu0 %v4861_v50  ;;  %v4644_v11 = vpack.c.bf16 %v2271_v10, %v2270_v9  ;;  %v3973_v9 = vld [vmem:[%s5931_s9 + $0x20] sm:$0xff] }
 0xa40   : > { %v4766_v12 = vpop.eup %4765 }
 0xa41   : > { %v1969_v13 = vsel %vm1239_vm6, %v4766_v12, 0.0 }
 0xa42   : > { %1970 = vadd.xlane.f32.xlu1 %v1969_v13 }
 0xa6d   : > { %v1879_v2 = vpop.f32.mrb[6].mxu0 }
 0xa6e   : > { %v1883_v15 = vadd.f32 %v1879_v2, %v1640_v63  ;;  %v4309_v16 = vpop.f32.mrb[7].mxu0  ;;  %v2264_v63 = vld [vmem:[%s5937_s15 + $0x40] sm:$0xff] }
 0xa6f   : > { %v4635_v1 = vpack.c.bf16 %v2265_v0, %v2264_v63 }
 0xacf   : > { %v1971_v17 = vpop.xlane.xlu1 %1970 }
 0xad0   : > { %4767 = vrcp.f32 %v1971_v17 }
 0xada   : > { %v4768_v18 = vpop.eup %4767 }
 0xadb   : > { %v1973_v19 = vmul.f32 %v4768_v18, %v4766_v12  ;;  %v3959_v12 = vld [vmem:[%s5936_s14] ss:$0 sm:$0xff] }
 0xadd   : > { %4318 = vmatmul.mubr.msk.f32.vlgmr.msra.gmra.mrb[8].mxu0 %vm1253_vm7, %v1973_v19 }
 0xade   : > { %4333 = vmatprep.mubr.msk.f32.mxu0 %vm4862_vm2, %v4863_v54 }
 0xbb0   : > { %v2047_v20 = vpop.f32.mrb[8].mxu0 }
 0xbb1   : > { %v4319_v21 = vpop.f32.mrb[9].mxu0  ;;  %4323 = vmatmul.mubr.msk.f32.vlgmr.msra.gmra.mrb[20].mxu1 %vm1163_vm4, %v2047_v20 }
 0xbb2   : > { %4368 = vmatprep.mubr.msk.f32.mxu1 %vm4862_vm2, %v4863_v54  ;;  %4624 = vmatpush3.bf16.msra.mxu1 %v4623_v42 }
 0xbb3   : > { %4625 = vmatprep.subr.bf16.mxu1 %v4861_v50 }
 0xbb6   : > { %4627 = vmatpush3.bf16.msra.mxu1 %v4626_v56 }
 0xbb7   : > { %4628 = vmatprep.subr.bf16.mxu1 %v4861_v50 }
 0xbba   : > { %4630 = vmatpush3.bf16.msra.mxu1 %v4629_v59 }
 0xbbb   : > { %4631 = vmatprep.subr.bf16.mxu1 %v4861_v50 }
 0xbbe   : > { %4633 = vmatpush3.bf16.msra.mxu1 %v4632_v62 }
 0xbbf   : > { %4634 = vmatprep.subr.bf16.mxu1 %v4861_v50 }
 0xbc2   : > { %4636 = vmatpush3.bf16.msra.mxu1 %v4635_v1 }
 0xbc3   : > { %4637 = vmatprep.subr.bf16.mxu1 %v4861_v50 }
 0xbc6   : > { %4639 = vmatpush3.bf16.msra.mxu1 %v4638_v5 }
 0xbc7   : > { %4640 = vmatprep.subr.bf16.mxu1 %v4861_v50 }
 0xbca   : > { %4642 = vmatpush3.bf16.msra.mxu1 %v4641_v8 }
 0xbcb   : > { %4643 = vmatprep.subr.bf16.mxu1 %v4861_v50 }
 0xbce   : > { %4645 = vmatpush3.bf16.msra.mxu1 %v4644_v11 }
 0xbcf   : > { %4407 = vmatprep.subr.mxu1 %v4863_v54 }
 0xc84   : > { %v2120_v22 = vpop.f32.mrb[20].mxu1 }
 0xc85   : > { %v2124_v23 = vadd.f32 %v2120_v22, %v1883_v15  ;;  %v4324_v24 = vpop.f32.mrb[21].mxu1 }
 0xc87   : > { %v2125_v26 = vadd.f32 %v2124_v23, %v5359_v40  ;;  %v2164_v40 = vld [vmem:[%s5935_s13 + $0x8] sm:$0xff] }
 0xc88   : > { %v4617_v35 = vpack.c.bf16 %v2164_v40, %v2163_v34 }
 0xc89   : > { %v5502_v27 = vadd.f32 %v3956_v25, %v2125_v26  ;;  %v3961_v25 = vld [vmem:[%s5938_s16] ss:$0 sm:$0xff] }
 0xc8a   : > { %4618 = vmatpush3.bf16.msra.mxu0 %v4617_v35  ;;  %v3966_v35 = vld [vmem:[%s5992_s29 + $0x20] sm:$0xff] }
 0xc8b   : > { %v2136_v28 = vsel %vm1042_vm1, %v5502_v27, 0.0  ;;  %4619 = vmatprep.subr.bf16.mxu0 %v4861_v50 }
 0xc8c   : > { %2137 = vadd.xlane.f32.xlu1 %v2136_v28 }
 0xc8e   : > { %4621 = vmatpush3.bf16.msra.mxu0 %v4620_v38  ;;  %v3969_v38 = vld [vmem:[%s5992_s29 + $0x38] sm:$0xff] }
 0xc8f   : > { %4646 = vmatprep.subr.bf16.mxu0 %v4861_v50  ;;  %v4650_v39 = vpack.c.bf16 %v3969_v38, %v3968_v37 }
 0xd19   : > { %v2138_v29 = vpop.xlane.xlu1 %2137 }
 0xd1a   : > { %v2139_v30 = vmul.f32 0.03125, %v2138_v29 }
 0xd1c   : > { %v2140_v31 = vsub.f32 %v5502_v27, %v2139_v30 }
 0xd1e   : > { %v2141_v32 = vmul.f32 %v2140_v31, %v2140_v31 }
 0xd20   : > { %v2142_v33 = vsel %vm1042_vm1, %v2141_v32, 0.0 }
 0xd21   : > { %2143 = vadd.xlane.f32.xlu1 %v2142_v33 }
 0xdae   : > { %v2144_v43 = vpop.xlane.xlu1 %2143 }
 0xdaf   : > { %v2145_v44 = vmul.f32 0.03125, %v2144_v43 }
 0xdb1   : > { %v2146_v45 = vadd.f32 1e-06, %v2145_v44 }
 0xdb3   : > { %4769 = vrsqrt.f32 %v2146_v45  ;;  %v3964_v45 = vld [vmem:[%s5993_s27 + $0x1] ss:$0 sm:$0xff] }
 0xdbd   : > { %v4770_v46 = vpop.eup %4769 }
 0xdbe   : > { %v2148_v48 = vmul.f32 %v4770_v46, %v2140_v31 }
 0xdc0   : > { %v2155_v51 = vmul.f32 %v3957_v47, %v2148_v48  ;;  %v3965_v47 = vld [vmem:[%s5994_s2 + $0x1] ss:$0 sm:$0xff] }
 0xdc2   : > { %v2162_v52 = vadd.f32 %v3958_v49, %v2155_v51  ;;  %v3971_v51 = vld [vmem:[%s5930_s8 + $0x1] ss:$0 sm:$0xff] }
 0xdc4   : > { %4334 = vmatmul.mubr.msk.f32.vlgmr.msra.gmra.mrb[10].mxu0 %vm1082_vm3, %v2162_v52 }
 0xdc5   : > { %4379 = vmatprep.mubr.msk.f32.mxu0 %vm4862_vm2, %v4863_v54 }
 0xe97   : > { %v2243_v13 = vpop.f32.mrb[10].mxu0 }
 0xe98   : > { %v2244_v14 = vadd.f32 %v3959_v12, %v2243_v13  ;;  %v4335_v2 = vpop.f32.mrb[11].mxu0 }
 0xe9a   : > { %v2248_v15 = vmul.f32 0.044715, %v2244_v14  ;;  %v2247_v21 = vmul.f32 0.5, %v2244_v14 }
 0xe9c   : > { %v2249_v16 = vmul.f32 %v2248_v15, %v2244_v14 }
 0xe9e   : > { %v2250_v17 = vmul.f32 %v2249_v16, %v2244_v14 }
 0xea0   : > { %v2251_v18 = vadd.f32 %v2250_v17, %v2244_v14 }
 0xea2   : > { %v2252_v19 = vmul.f32 0.7978846, %v2251_v18 }
 0xea4   : > { %4771 = vtanh.f32 %v2252_v19 }
 0xeae   : > { %v4772_v20 = vpop.eup %4771 }
 0xeaf   : > { %v2254_v22 = vadd.f32 1.0, %v4772_v20 }
 0xeb1   : > { %v2255_v23 = vmul.f32 %v2254_v22, %v2247_v21 }
 0xeb3   : > { %4369 = vmatmul.mubr.f32.vlgmr.msra.gmra.mrb[22].mxu1 %v2255_v23 }
 0xeb4   : > { %4409 = vmatprep.mubr.msk.f32.mxu1 %vm4862_vm2, %v4863_v54  ;;  %4408 = vmatpush3.msra.mxu1 %v3973_v9 }
 0xeb5   : > { %4417 = vmatprep.subr.mxu1 %v4863_v54 }
 0xf86   : > { %v2338_v24 = vpop.f32.mrb[22].mxu1 }
 0xf87   : > { %v2342_v26 = vadd.f32 %v2338_v24, %v5502_v27  ;;  %v4370_v28 = vpop.f32.mrb[23].mxu1  ;;  %v3967_v27 = vld [vmem:[%s5992_s29 + $0x28] sm:$0xff] }
 0xf88   : > { %v4647_v36 = vpack.c.bf16 %v3967_v27, %v3966_v35 }
 0xf89   : > { %v5596_v29 = vadd.f32 %v3961_v25, %v2342_v26  ;;  %v3974_v26 = vld [vmem:[%s5931_s9 + $0x28] sm:$0xff] }
 0xf8a   : > { %4648 = vmatpush3.bf16.msra.mxu0 %v4647_v36 }
 0xf8b   : > { %v2355_v30 = vsel %vm1042_vm1, %v5596_v29, 0.0  ;;  %4649 = vmatprep.subr.bf16.mxu0 %v4861_v50 }
 0xf8c   : > { %2356 = vadd.xlane.f32.xlu0 %v2355_v30 }
 0xf8e   : > { %4651 = vmatpush3.bf16.msra.mxu0 %v4650_v39 }
 0xf8f   : > { %4382 = vmatprep.subr.mxu0 %v4863_v54 }
0x1019   : > { %v2357_v31 = vpop.xlane.xlu0 %2356 }
0x101a   : > { %v2358_v32 = vmul.f32 0.03125, %v2357_v31 }
0x101c   : > { %v2359_v33 = vsub.f32 %v5596_v29, %v2358_v32 }
0x101e   : > { %v2360_v34 = vmul.f32 %v2359_v33, %v2359_v33 }
0x1020   : > { %v2361_v40 = vsel %vm1042_vm1, %v2360_v34, 0.0 }
0x1021   : > { %2362 = vadd.xlane.f32.xlu1 %v2361_v40 }
0x10ae   : > { %v2363_v41 = vpop.xlane.xlu1 %2362 }
0x10af   : > { %v2364_v42 = vmul.f32 0.03125, %v2363_v41 }
0x10b1   : > { %v2365_v43 = vadd.f32 1e-06, %v2364_v42 }
0x10b3   : > { %4773 = vrsqrt.f32 %v2365_v43 }
0x10bd   : > { %v4774_v44 = vpop.eup %4773 }
0x10be   : > { %v2367_v46 = vmul.f32 %v4774_v44, %v2359_v33 }
0x10c0   : > { %v2374_v48 = vmul.f32 %v3964_v45, %v2367_v46 }
0x10c2   : > { %v2381_v49 = vadd.f32 %v3965_v47, %v2374_v48 }
0x10c4   : > { %4380 = vmatmul.mubr.msk.f32.vlgmr.msra.gmra.mrb[12].mxu0 %vm1082_vm3, %v2381_v49 }
0x10c5   : > { %4384 = vmatprep.mubr.msk.f32.mxu0 %vm4862_vm2, %v4863_v54 }
0x1197   : > { %v2464_v52 = vpop.f32.mrb[12].mxu0 }
0x1198   : > { %v5628_v53 = vadd.f32 %v3971_v51, %v2464_v52  ;;  %v4381_v55 = vpop.f32.mrb[13].mxu0  ;;  %v3975_v51 = vld [vmem:[%s5931_s9 + $0x30] sm:$0xff] }
0x119a   : > { %2562 = vrot.lane.b32.xlu0 %v5628_v53, %s4864_s6  ;;  %2474 = vrot.lane.b32.xlu1 %v5628_v53, %s5995_s28  ;;  %s5996_s6 = smov 120   ;;  %s6001_s28 = smov 48  }
0x120c   : > { %v2475_v56 = vpop.permute.xlu1 %2474  ;;  %v2563_v57 = vpop.permute.xlu0 %2562 }
0x120d   : > { %4383 = vmatpush3.xpose.msk.msra.mxu0 %vm1163_vm4, %v2475_v56 }
0x120e   : > { %4387 = vmatprep.subr.mxu0 %v4863_v54 }
0x1210   : > { %4385 = vmatmul.mubr.msk.f32.vlgmr.msra.gmra.mrb[14].mxu0 %vm1163_vm4, %v5628_v53 }
0x1211   : > { %4388 = vmatpush3.msk.msra.mxu0 %vm1257_vm5, %v2563_v57  ;;  %4389 = vmatprep.mubr.msk.f32.mxu0 %vm4862_vm2, %v4863_v54 }
0x1212   : > { %4392 = vmatprep.subr.mxu0 %v4863_v54 }
0x12e3   : > { %v2546_v58 = vpop.f32.mrb[14].mxu0 }
0x12e4   : > { %v2550_v59 = vmul.f32 0.35355338, %v2546_v58  ;;  %v4386_v60 = vpop.f32.mrb[15].mxu0 }
0x12e6   : > { %v2551_v61 = vsel %vm1239_vm6, %v2550_v59, -inf }
0x12e7   : > { %2552 = vmax.xlane.f32.xlu1 %v2551_v61 }
0x12f8   : > { %2639 = vrot.lane.b32.xlu1 %v5628_v53, %s5996_s6  ;;  %s6002_s6 = smov 104  }
0x1374   : > { %v2553_v62 = vpop.xlane.xlu1 %2552 }
0x1375   : > { %v2554_v63 = vsub.f32 %v2550_v59, %v2553_v62 }
0x1377   : > { %v2555_v0 = vmul.f32 1.442695, %v2554_v63 }
0x1378   : > { %v2640_v8 = vpop.permute.xlu1 %2639 }
0x1379   : > { %4775 = vpow2.f32 %v2555_v0 }
0x1383   : > { %v4776_v1 = vpop.eup %4775 }
0x1384   : > { %v2557_v3 = vsel %vm1239_vm6, %v4776_v1, 0.0 }
0x1385   : > { %2558 = vadd.xlane.f32.xlu0 %v2557_v3  ;;  %v3976_v3 = vld [vmem:[%s5931_s9 + $0x38] sm:$0xff] }
0x139b   : > { %2641 = vrot.lane.b32.xlu0 %v5628_v53, %s5997_s24  ;;  %s6003_s24 = smov 72  }
0x1412   : > { %v2559_v4 = vpop.xlane.xlu0 %2558 }
0x1413   : > { %4777 = vrcp.f32 %v2559_v4 }
0x1416   : > { %v2642_v7 = vpop.permute.xlu0 %2641 }
0x141d   : > { %v4778_v5 = vpop.eup %4777 }
0x141e   : > { %v2561_v6 = vmul.f32 %v4778_v5, %v4776_v1 }
0x1420   : > { %4390 = vmatmul.mubr.msk.f32.vlgmr.msra.gmra.mrb[16].mxu0 %vm1253_vm7, %v2561_v6 }
0x1421   : > { %4393 = vmatpush3.xpose.msk.msra.mxu0 %vm1163_vm4, %v2642_v7  ;;  %4394 = vmatprep.mubr.msk.f32.mxu0 %vm4862_vm2, %v4863_v54 }
0x1422   : > { %4397 = vmatprep.subr.mxu0 %v4863_v54 }
0x1424   : > { %4395 = vmatmul.mubr.msk.f32.vlgmr.msra.gmra.mrb[18].mxu0 %vm1163_vm4, %v2640_v8 }
0x1425   : > { %4399 = vmatprep.mubr.msk.f32.mxu0 %vm4862_vm2, %v4863_v54 }
0x14f3   : > { %v2635_v10 = vpop.f32.mrb[16].mxu0 }
0x14f4   : > { %v4391_v11 = vpop.f32.mrb[17].mxu0  ;;  %4410 = vmatmul.mubr.msk.f32.vlgmr.msra.gmra.mrb[24].mxu1 %vm1163_vm4, %v2635_v10 }
0x14f5   : > { %4419 = vmatprep.mubr.msk.f32.mxu1 %vm4862_vm2, %v4863_v54 }
0x14f7   : > { %v2713_v12 = vpop.f32.mrb[18].mxu0 }
0x14f8   : > { %v2717_v13 = vmul.f32 0.35355338, %v2713_v12  ;;  %v4396_v14 = vpop.f32.mrb[19].mxu0 }
0x14f9   : > { %v3998_v14 = vld [vmem:[%s5932_s10 + $0x1] ss:$0 sm:$0xff] }
0x14fa   : > { %v2718_v2 = vsel %vm1239_vm6, %v2717_v13, -inf }
0x14fb   : > { %2719 = vmax.xlane.f32.xlu0 %v2718_v2 }
0x1511   : > { %2729 = vrot.lane.b32.xlu0 %v5628_v53, %s5998_s25  ;;  %s6004_s25 = smov 40  }
0x1515   : > { %2952 = vrot.lane.b32.xlu0 %v5628_v53, %s5999_s1 }
0x1588   : > { %v2720_v15 = vpop.xlane.xlu0 %2719 }
0x1589   : > { %v2721_v16 = vsub.f32 %v2717_v13, %v2720_v15 }
0x158b   : > { %v2722_v17 = vmul.f32 1.442695, %v2721_v16 }
0x158c   : > { %v2730_v18 = vpop.permute.xlu0 %2729 }
0x158d   : > { %4779 = vpow2.f32 %v2722_v17  ;;  %4398 = vmatpush3.msk.msra.mxu0 %vm1257_vm5, %v2730_v18 }
0x158e   : > { %4402 = vmatprep.subr.mxu0 %v4863_v54 }
0x1590   : > { %v2953_v32 = vpop.permute.xlu0 %2952 }
0x1597   : > { %v4780_v19 = vpop.eup %4779 }
0x1598   : > { %v2724_v20 = vsel %vm1239_vm6, %v4780_v19, 0.0 }
0x1599   : > { %2725 = vadd.xlane.f32.xlu1 %v2724_v20 }
0x15aa   : > { %2954 = vrot.lane.b32.xlu1 %v5628_v53, %s6000_s23  ;;  %s6005_s23 = sld [smem:[#allocation19_spill]] }
0x15c7   : > { %v2948_v21 = vpop.f32.mrb[24].mxu1 }
0x15c8   : > { %v4411_v22 = vpop.f32.mrb[25].mxu1 }
0x15c9   : > { %v4003_v22 = vld [vmem:[%s5935_s13 + $0x20] sm:$0xff] }
0x1626   : > { %v2726_v23 = vpop.xlane.xlu1 %2725 }
0x1627   : > { %4781 = vrcp.f32 %v2726_v23 }
0x162a   : > { %v2955_v30 = vpop.permute.xlu1 %2954 }
0x1631   : > { %v4782_v24 = vpop.eup %4781 }
0x1632   : > { %v2728_v25 = vmul.f32 %v4782_v24, %v4780_v19  ;;  %v4005_v24 = vld [vmem:[%s5935_s13 + $0x30] sm:$0xff] }
0x1634   : > { %4400 = vmatmul.mubr.msk.f32.vlgmr.msra.gmra.mrb[20].mxu0 %vm1253_vm7, %v2728_v25  ;;  %v4006_v25 = vld [vmem:[%s5935_s13 + $0x38] sm:$0xff] }
0x1635   : > { %4403 = vmatpush3.msra.mxu0 %v3974_v26  ;;  %4404 = vmatprep.mubr.msk.f32.mxu0 %vm4862_vm2, %v4863_v54  ;;  %v4656_v26 = vpack.c.bf16 %v4006_v25, %v4005_v24  ;;  %v3698_v25 = vld [vmem:[%s5941_s19 + $0x10] sm:$0xff] }
0x1636   : > { %4412 = vmatprep.subr.mxu0 %v4863_v54 }
0x1707   : > { %v2802_v28 = vpop.f32.mrb[20].mxu0 }
0x1708   : > { %v4401_v31 = vpop.f32.mrb[21].mxu0  ;;  %4405 = vmatmul.mubr.msk.f32.vlgmr.msra.gmra.mrb[22].mxu0 %vm1163_vm4, %v2802_v28  ;;  %v4010_v28 = vld [vmem:[%s5937_s15 + $0x80] sm:$0xff] }
0x1709   : > { %4413 = vmatpush3.xpose.msk.msra.mxu0 %vm1163_vm4, %v2955_v30  ;;  %4414 = vmatprep.mubr.msk.f32.mxu0 %vm4862_vm2, %v4863_v54  ;;  %v4011_v30 = vld [vmem:[%s5937_s15 + $0x88] sm:$0xff] }
0x170a   : > { %4422 = vmatprep.subr.mxu0 %v4863_v54  ;;  %v4659_v31 = vpack.c.bf16 %v4011_v30, %v4010_v28 }
0x170c   : > { %4415 = vmatmul.mubr.msk.f32.vlgmr.msra.gmra.mrb[24].mxu0 %vm1163_vm4, %v2953_v32 }
0x170d   : > { %4424 = vmatprep.mubr.msk.f32.mxu0 %vm4862_vm2, %v4863_v54  ;;  %4423 = vmatpush3.msra.mxu0 %v3975_v51  ;;  %v4019_v51 = vld [vmem:[%s5937_s15 + $0xc8] sm:$0xff] }
0x170e   : > { %4432 = vmatprep.subr.mxu0 %v4863_v54 }
0x17db   : > { %v2875_v33 = vpop.f32.mrb[22].mxu0 }
0x17dc   : > { %v2949_v34 = vadd.f32 %v2948_v21, %v2875_v33  ;;  %v4406_v40 = vpop.f32.mrb[23].mxu0 }
0x17df   : > { %v3026_v35 = vpop.f32.mrb[24].mxu0 }
0x17e0   : > { %v3030_v27 = vmul.f32 0.35355338, %v3026_v35  ;;  %v4416_v36 = vpop.f32.mrb[25].mxu0  ;;  %v4001_v35 = vld [vmem:[%s5933_s11 + $0x1] ss:$0 sm:$0xff] }
0x17e1   : > { %v4002_v36 = vld [vmem:[%s5934_s12 + $0x1] ss:$0 sm:$0xff] }
0x17e2   : > { %v3031_v37 = vsel %vm1239_vm6, %v3030_v27, -inf }
0x17e3   : > { %3032 = vmax.xlane.f32.xlu0 %v3031_v37 }
0x17f9   : > { %3042 = vrot.lane.b32.xlu0 %v5628_v53, %s6001_s28  ;;  %s3870_s28 = sshll.u32 %s702_s26, 4  ;;  %s5882_s28 = int_to_ptr.vmem [resolvable:$true] %s3870_s28 }
0x17fa   : > { %s4797_s1 = scalar_lea.vmem %s5882_s28, 16 }
0x17fb   : > { %p4798_p11 = scmp.ne.s32.totalorder %s5882_s28, %s4797_s1 }
0x17fd   : > { %3193 = vrot.lane.b32.xlu0 %v5628_v53, %s6002_s6  ;;  %p4799_p12 = pnand %p4798_p11, %p5034_p5 }
0x17ff   : > { %p4800_p13 = pneg %p4799_p12 }
0x1870   : > { %v3033_v38 = vpop.xlane.xlu0 %3032 }
0x1871   : > { %v3034_v39 = vsub.f32 %v3030_v27, %v3033_v38 }
0x1873   : > { %v3035_v41 = vmul.f32 1.442695, %v3034_v39  ;;  %v4012_v39 = vld [vmem:[%s5937_s15 + $0x90] sm:$0xff] }
0x1874   : > { %v3043_v42 = vpop.permute.xlu0 %3042 }
0x1875   : > { %4783 = vpow2.f32 %v3035_v41  ;;  %4418 = vmatpush3.msk.msra.mxu1 %vm1257_vm5, %v3043_v42  ;;  %v4013_v41 = vld [vmem:[%s5937_s15 + $0x98] sm:$0xff] }
0x1876   : > { %4427 = vmatprep.subr.mxu1 %v4863_v54  ;;  %v4662_v42 = vpack.c.bf16 %v4013_v41, %v4012_v39  ;;  %v3776_v41 = vld [vmem:[%s5943_s21 + $0x10] sm:$0xff] }
0x1878   : > { %v3194_v49 = vpop.permute.xlu0 %3193 }
0x187f   : > { %v4784_v43 = vpop.eup %4783 }
0x1880   : > { %v3037_v44 = vsel %vm1239_vm6, %v4784_v43, 0.0 }
0x1881   : > { %3038 = vadd.xlane.f32.xlu1 %v3037_v44  ;;  %v4015_v44 = vld [vmem:[%s5937_s15 + $0xa8] sm:$0xff] }
0x1892   : > { %3195 = vrot.lane.b32.xlu1 %v5628_v53, %s6003_s24 }
0x190e   : > { %v3039_v45 = vpop.xlane.xlu1 %3038 }
0x190f   : > { %4785 = vrcp.f32 %v3039_v45 }
0x1912   : > { %v3196_v48 = vpop.permute.xlu1 %3195 }
0x1919   : > { %v4786_v46 = vpop.eup %4785 }
0x191a   : > { %v3041_v47 = vmul.f32 %v4786_v46, %v4784_v43  ;;  %v4014_v43 = vld [vmem:[%s5937_s15 + $0xa0] sm:$0xff]  ;;  %v4016_v46 = vld [vmem:[%s5937_s15 + $0xb0] sm:$0xff] }
0x191b   : > { %v4665_v45 = vpack.c.bf16 %v4015_v44, %v4014_v43  ;;  %v3778_v44 = vld [vmem:[%s5943_s21 + $0x20] sm:$0xff] }
0x191c   : > { %4420 = vmatmul.mubr.msk.f32.vlgmr.msra.gmra.mrb[26].mxu1 %vm1253_vm7, %v3041_v47  ;;  %v4017_v47 = vld [vmem:[%s5937_s15 + $0xb8] sm:$0xff] }
0x191d   : > { %4428 = vmatpush3.xpose.msk.msra.mxu1 %vm1163_vm4, %v3196_v48  ;;  %4429 = vmatprep.mubr.msk.f32.mxu1 %vm4862_vm2, %v4863_v54  ;;  %v4668_v48 = vpack.c.bf16 %v4017_v47, %v4016_v46 }
0x191e   : > { %4437 = vmatprep.subr.mxu1 %v4863_v54 }
0x1920   : > { %4430 = vmatmul.mubr.msk.f32.vlgmr.msra.gmra.mrb[28].mxu1 %vm1163_vm4, %v3194_v49  ;;  %v4018_v49 = vld [vmem:[%s5937_s15 + $0xc0] sm:$0xff] }
0x1921   : > { %4439 = vmatprep.mubr.msk.f32.mxu1 %vm4862_vm2, %v4863_v54  ;;  %4438 = vmatpush3.msra.mxu1 %v3976_v3 }
0x1922   : > { %4658 = vmatprep.subr.bf16.mxu1 %v4861_v50 }
0x19ef   : > { %v3115_v52 = vpop.f32.mrb[26].mxu1 }
0x19f0   : > { %v4421_v55 = vpop.f32.mrb[27].mxu1  ;;  %4425 = vmatmul.mubr.msk.f32.vlgmr.msra.gmra.mrb[26].mxu0 %vm1163_vm4, %v3115_v52  ;;  %v4671_v52 = vpack.c.bf16 %v4019_v51, %v4018_v49 }
0x19f1   : > { %4434 = vmatprep.mubr.msk.f32.mxu0 %vm4862_vm2, %v4863_v54  ;;  %v4020_v55 = vld [vmem:[%s5937_s15 + $0xd0] sm:$0xff] }
0x19f3   : > { %v3267_v56 = vpop.f32.mrb[28].mxu1 }
0x19f4   : > { %v3271_v57 = vmul.f32 0.35355338, %v3267_v56  ;;  %v4431_v58 = vpop.f32.mrb[29].mxu1  ;;  %v4021_v56 = vld [vmem:[%s5937_s15 + $0xd8] sm:$0xff] }
0x19f5   : > { %v4022_v58 = vld [vmem:[%s5937_s15 + $0xe0] sm:$0xff] }
0x19f6   : > { %v3272_v59 = vsel %vm1239_vm6, %v3271_v57, -inf }
0x19f7   : > { %3273 = vmax.xlane.f32.xlu0 %v3272_v59  ;;  %v4023_v59 = vld [vmem:[%s5937_s15 + $0xe8] sm:$0xff] }
0x1a0d   : > { %3283 = vrot.lane.b32.xlu0 %v5628_v53, %s6004_s25  ;;  %s3858_s25 = scalar_lea.sflag [#allocation3], %s701_s4 }
0x1a84   : > { %v3274_v60 = vpop.xlane.xlu0 %3273 }
0x1a85   : > { %v3275_v61 = vsub.f32 %v3271_v57, %v3274_v60  ;;  %v4674_v57 = vpack.c.bf16 %v4021_v56, %v4020_v55  ;;  %v4677_v60 = vpack.c.bf16 %v4023_v59, %v4022_v58 }
0x1a87   : > { %v3276_v62 = vmul.f32 1.442695, %v3275_v61  ;;  %v4024_v61 = vld [vmem:[%s5937_s15 + $0xf0] sm:$0xff] }
0x1a88   : > { %v3284_v63 = vpop.permute.xlu0 %3283 }
0x1a89   : > { %4787 = vpow2.f32 %v3276_v62  ;;  %4433 = vmatpush3.msk.msra.mxu0 %vm1257_vm5, %v3284_v63  ;;  %v4025_v62 = vld [vmem:[%s5937_s15 + $0xf8] sm:$0xff] }
0x1a8a   : > { %4652 = vmatprep.subr.bf16.mxu0 %v4861_v50  ;;  %v4680_v63 = vpack.c.bf16 %v4025_v62, %v4024_v61 }
0x1a93   : > { %v4788_v0 = vpop.eup %4787 }
0x1a94   : > { %v3278_v1 = vsel %vm1239_vm6, %v4788_v0, 0.0 }
0x1a95   : > { %3279 = vadd.xlane.f32.xlu1 %v3278_v1 }
0x1ac3   : > { %v3188_v53 = vpop.f32.mrb[26].mxu0 }
0x1ac4   : > { %v3192_v4 = vadd.f32 %v3188_v53, %v2949_v34  ;;  %v4426_v5 = vpop.f32.mrb[27].mxu0 }
0x1b22   : > { %v3280_v6 = vpop.xlane.xlu1 %3279 }
0x1b23   : > { %4789 = vrcp.f32 %v3280_v6 }
0x1b2d   : > { %v4790_v7 = vpop.eup %4789 }
0x1b2e   : > { %v3282_v8 = vmul.f32 %v4790_v7, %v4788_v0  ;;  %v4008_v0 = vld [vmem:[%s5936_s14 + $0x1] ss:$0 sm:$0xff] }
0x1b30   : > { %4435 = vmatmul.mubr.msk.f32.vlgmr.msra.gmra.mrb[28].mxu0 %vm1253_vm7, %v3282_v8 }
0x1b31   : > { %4450 = vmatprep.mubr.msk.f32.mxu0 %vm4862_vm2, %v4863_v54 }
0x1c03   : > { %v3356_v9 = vpop.f32.mrb[28].mxu0 }
0x1c04   : > { %v4436_v10 = vpop.f32.mrb[29].mxu0  ;;  %4440 = vmatmul.mubr.msk.f32.vlgmr.msra.gmra.mrb[30].mxu1 %vm1163_vm4, %v3356_v9 }
0x1c05   : > { %4485 = vmatprep.mubr.msk.f32.mxu1 %vm4862_vm2, %v4863_v54  ;;  %4660 = vmatpush3.bf16.msra.mxu1 %v4659_v31 }
0x1c06   : > { %4661 = vmatprep.subr.bf16.mxu1 %v4861_v50 }
0x1c09   : > { %4663 = vmatpush3.bf16.msra.mxu1 %v4662_v42  ;;  %v3777_v42 = vld [vmem:[%s5943_s21 + $0x18] sm:$0xff] }
0x1c0a   : > { %4664 = vmatprep.subr.bf16.mxu1 %v4861_v50  ;;  %v4692_v43 = vpack.c.bf16 %v3777_v42, %v3776_v41 }
0x1c0d   : > { %4666 = vmatpush3.bf16.msra.mxu1 %v4665_v45  ;;  %v3779_v45 = vld [vmem:[%s5943_s21 + $0x28] sm:$0xff] }
0x1c0e   : > { %4667 = vmatprep.subr.bf16.mxu1 %v4861_v50  ;;  %v4695_v46 = vpack.c.bf16 %v3779_v45, %v3778_v44 }
0x1c11   : > { %4669 = vmatpush3.bf16.msra.mxu1 %v4668_v48 }
0x1c12   : > { %4670 = vmatprep.subr.bf16.mxu1 %v4861_v50 }
0x1c15   : > { %4672 = vmatpush3.bf16.msra.mxu1 %v4671_v52 }
0x1c16   : > { %4673 = vmatprep.subr.bf16.mxu1 %v4861_v50 }
0x1c19   : > { %4675 = vmatpush3.bf16.msra.mxu1 %v4674_v57 }
0x1c1a   : > { %4676 = vmatprep.subr.bf16.mxu1 %v4861_v50 }
0x1c1d   : > { %4678 = vmatpush3.bf16.msra.mxu1 %v4677_v60 }
0x1c1e   : > { %4679 = vmatprep.subr.bf16.mxu1 %v4861_v50 }
0x1c21   : > { %4681 = vmatpush3.bf16.msra.mxu1 %v4680_v63 }
0x1cd7   : > { %v3429_v11 = vpop.f32.mrb[30].mxu1 }
0x1cd8   : > { %v3433_v12 = vadd.f32 %v3429_v11, %v3192_v4  ;;  %v4441_v13 = vpop.f32.mrb[31].mxu1 }
0x1cda   : > { %v3434_v2 = vadd.f32 %v3433_v12, %v5596_v29  ;;  %v4004_v29 = vld [vmem:[%s5935_s13 + $0x28] sm:$0xff] }
0x1cdb   : > { %v4653_v23 = vpack.c.bf16 %v4004_v29, %v4003_v22 }
0x1cdc   : > { %v5733_v15 = vadd.f32 %v3998_v14, %v3434_v2  ;;  %v4027_v14 = vld [vmem:[%s5938_s16 + $0x1] ss:$0 sm:$0xff] }
0x1cdd   : > { %4654 = vmatpush3.bf16.msra.mxu0 %v4653_v23  ;;  %v3696_v23 = vld [vmem:[%s5941_s19] sm:$0xff] }
0x1cde   : > { %v3448_v16 = vsel %vm1042_vm1, %v5733_v15, 0.0  ;;  %4655 = vmatprep.subr.bf16.mxu0 %v4861_v50 }
0x1cdf   : > { %3449 = vadd.xlane.f32.xlu1 %v3448_v16 }
0x1ce1   : > { %4657 = vmatpush3.bf16.msra.mxu0 %v4656_v26  ;;  %v3699_v26 = vld [vmem:[%s5941_s19 + $0x18] sm:$0xff] }
0x1ce2   : > { %4682 = vmatprep.subr.bf16.mxu0 %v4861_v50  ;;  %v4686_v28 = vpack.c.bf16 %v3699_v26, %v3698_v25 }
0x1d6c   : > { %v3450_v17 = vpop.xlane.xlu1 %3449 }
0x1d6d   : > { %v3451_v18 = vmul.f32 0.03125, %v3450_v17 }
0x1d6f   : > { %v3452_v19 = vsub.f32 %v5733_v15, %v3451_v18 }
0x1d71   : > { %v3453_v20 = vmul.f32 %v3452_v19, %v3452_v19 }
0x1d73   : > { %v3454_v21 = vsel %vm1042_vm1, %v3453_v20, 0.0 }
0x1d74   : > { %3455 = vadd.xlane.f32.xlu1 %v3454_v21 }
0x1e01   : > { %v3456_v32 = vpop.xlane.xlu1 %3455 }
0x1e02   : > { %v3457_v33 = vmul.f32 0.03125, %v3456_v32 }
0x1e04   : > { %v3458_v34 = vadd.f32 1e-06, %v3457_v33 }
0x1e06   : > { %4791 = vrsqrt.f32 %v3458_v34  ;;  %v4028_v34 = vld [vmem:[%s5939_s17] ss:$0 sm:$0xff] }
0x1e10   : > { %v4792_v40 = vpop.eup %4791 }
0x1e11   : > { %v3460_v27 = vmul.f32 %v4792_v40, %v3452_v19 }
0x1e13   : > { %v3467_v37 = vmul.f32 %v4001_v35, %v3460_v27  ;;  %v3774_v35 = vld [vmem:[%s5943_s21] sm:$0xff]  ;;  %v3775_v27 = vld [vmem:[%s5943_s21 + $0x8] sm:$0xff] }
0x1e15   : > { %v3474_v38 = vadd.f32 %v4002_v36, %v3467_v37  ;;  %v4029_v36 = vld [vmem:[%s5940_s18] ss:$0 sm:$0xff] }
0x1e17   : > { %4451 = vmatmul.mubr.msk.f32.vlgmr.msra.gmra.mrb[30].mxu0 %vm1082_vm3, %v3474_v38  ;;  %v4689_v38 = vpack.c.bf16 %v3775_v27, %v3774_v35 }
0x1e18   : > { %4496 = vmatprep.mubr.msk.f32.mxu0 %vm4862_vm2, %v4863_v54 }
0x1eea   : > { %v3557_v1 = vpop.f32.mrb[30].mxu0 }
0x1eeb   : > { %v3558_v3 = vadd.f32 %v4008_v0, %v3557_v1  ;;  %v4452_v53 = vpop.f32.mrb[31].mxu0 }
0x1eed   : > { %v3562_v4 = vmul.f32 0.044715, %v3558_v3  ;;  %v3561_v10 = vmul.f32 0.5, %v3558_v3 }
0x1eef   : > { %v3563_v5 = vmul.f32 %v3562_v4, %v3558_v3 }
0x1ef1   : > { %v3564_v6 = vmul.f32 %v3563_v5, %v3558_v3 }
0x1ef3   : > { %v3565_v7 = vadd.f32 %v3564_v6, %v3558_v3 }
0x1ef5   : > { %v3566_v8 = vmul.f32 0.7978846, %v3565_v7 }
0x1ef7   : > { %4793 = vtanh.f32 %v3566_v8 }
0x1f01   : > { %v4794_v9 = vpop.eup %4793 }
0x1f02   : > { %v3568_v11 = vadd.f32 1.0, %v4794_v9 }
0x1f04   : > { %v3569_v12 = vmul.f32 %v3568_v11, %v3561_v10 }
0x1f06   : > { %4486 = vmatmul.mubr.f32.vlgmr.msra.gmra.mrb[32].mxu1 %v3569_v12 }
0x1fd9   : > { %v3653_v13 = vpop.f32.mrb[32].mxu1 }
0x1fda   : > { %v3657_v2 = vadd.f32 %v3653_v13, %v5733_v15  ;;  %v4487_v16 = vpop.f32.mrb[33].mxu1  ;;  %v3697_v15 = vld [vmem:[%s5941_s19 + $0x8] sm:$0xff] }
0x1fdb   : > { %v4683_v24 = vpack.c.bf16 %v3697_v15, %v3696_v23 }
0x1fdc   : > { %v3666_v17 = vadd.f32 %v4027_v14, %v3657_v2 }
0x1fdd   : > { %4684 = vmatpush3.bf16.msra.mxu0 %v4683_v24 }
0x1fde   : > { %v3669_v18 = vsel %vm1042_vm1, %v3666_v17, 0.0  ;;  %4685 = vmatprep.subr.bf16.mxu0 %v4861_v50 }
0x1fdf   : > { %3670 = vadd.xlane.f32.xlu1 %v3669_v18 }
0x1fe1   : > { %4687 = vmatpush3.bf16.msra.mxu0 %v4686_v28 }
0x1fe2   : > { %4688 = vmatprep.subr.bf16.mxu0 %v4861_v50 }
0x206c   : > { %v3671_v19 = vpop.xlane.xlu1 %3670 }
0x206d   : > { %v3672_v20 = vmul.f32 0.03125, %v3671_v19 }
0x206f   : > { %v3673_v21 = vsub.f32 %v3666_v17, %v3672_v20 }
0x2071   : > { %v3674_v22 = vmul.f32 %v3673_v21, %v3673_v21 }
0x2073   : > { %v3675_v29 = vsel %vm1042_vm1, %v3674_v22, 0.0 }
0x2074   : > { %3676 = vadd.xlane.f32.xlu0 %v3675_v29 }
0x2101   : > { %v3677_v30 = vpop.xlane.xlu0 %3676 }
0x2102   : > { %v3678_v31 = vmul.f32 0.03125, %v3677_v30 }
0x2104   : > { %v3679_v32 = vadd.f32 1e-06, %v3678_v31 }
0x2106   : > { %4795 = vrsqrt.f32 %v3679_v32 }
0x2110   : > { %v4796_v33 = vpop.eup %4795 }
0x2111   : > { %v3681_v40 = vmul.f32 %v4796_v33, %v3673_v21 }
0x2113   : > { %v3688_v37 = vmul.f32 %v4028_v34, %v3681_v40 }
0x2115   : > { %v3695_v39 = vadd.f32 %v4029_v36, %v3688_v37 }
0x2117   : > { %4497 = vmatmul.mubr.msk.f32.vlgmr.msra.gmra.mrb[32].mxu0 %vm1082_vm3, %v3695_v39 }
0x2118   : > { %4690 = vmatpush3.bf16.msra.mxu0 %v4689_v38  ;;  %4511 = vmatprep.mubr.msk.f32.mxu0 %vm4862_vm2, %v4863_v54  ;;  %v3700_v54 = vld [vmem:[%s5942_s20] sm:$0x1] }
0x2119   : > { %4691 = vmatprep.subr.bf16.mxu0 %v4861_v50 }
0x211c   : > { %4693 = vmatpush3.bf16.msra.mxu0 %v4692_v43 }
0x211d   : > { %4694 = vmatprep.subr.bf16.mxu0 %v4861_v50  ;;  %v3780_v50 = vld [vmem:[%s6005_s23] sm:$0x1]  ;;  %s4801_s23 = sshll.u32 %s4875_s5, 4  ;;  %s4802_s23 = int_to_ptr.vmem [resolvable:$false] %s4801_s23 }
0x211e   : > { %s4803_s2 = scalar_lea.vmem %s4802_s23, 32  ;;  %p4804_p0 = scmp.lt.s32.totalorder %s5882_s28, %s4802_s23 }
0x211f   : > { %p4805_p1 = scmp.lt.s32.totalorder %s4803_s2, %s4797_s1 }
0x2120   : > { %4696 = vmatpush3.bf16.msra.mxu0 %v4695_v46 }
0x2121   : > { %p4806_p2 = por %p4805_p1, %p4804_p0 }
0x2123   : > { %p4807_p3 = pnand %p4806_p2, %p4800_p13 }
0x21ea   : > { %v3770_v47 = vpop.f32.mrb[32].mxu0 }
0x21eb   : > { %v3771_v48 = vadd.f32 %v3770_v47, %v3700_v54  ;;  %v4498_v49 = vpop.f32.mrb[33].mxu0 }
0x21ed   : > { %4512 = vmatmul.mubr.msk.f32.vlgmr.msra.gmra.mrb[34].mxu0 %vm3781_vm8, %v3771_v48 }
0x22c0   : > { %v3851_v51 = vpop.f32.mrb[34].mxu0 }
0x22c1   : > { %v3852_v52 = vadd.f32 %v3851_v51, %v3780_v50  ;;  %v4513_v55 = vpop.f32.mrb[35].mxu0 }
0x22c3   : > { %3856 = vst.msk [vmem:[%s702_s26] sm:$0x1] %vm3855_vm9, %v3852_v52 }
0x22c4   : > { %4810 = shalt.err (!%p4807_p3)
}
0x22c5   : > { %s4811_s4 = scalar_lea.hbm %s5880_s0, 16  ;;  %s4815_s6 = scalar_lea.hbm %s6006_s3, 32 }
0x22c6   : > { %p4812_p4 = scmp.ne.s32.totalorder %s5880_s0, %s4811_s4  ;;  %p4816_p9 = scmp.lt.u32.totalorder %s5880_s0, %s6006_s3 }
0x22c7   : > { %p4817_p10 = scmp.lt.u32.totalorder %s4815_s6, %s4811_s4  ;;  %p4819_p12 = scmp.lt.u32.totalorder %s4811_s4, %s5880_s0 }
0x22c8   : > { %p4813_p7 = pnand %p4812_p4, %p5034_p5 }
0x22c9   : > { %p4818_p11 = por %p4817_p10, %p4816_p9 }
0x22ca   : > { %p4814_p8 = pneg %p4813_p7 }
0x22cb   : > { %p4820_p13 = por %p4819_p12, %p4818_p11 }
0x22cd   : > { %p4821_p0 = pnand %p4820_p13, %p4814_p8 }
0x22cf   : > { %4824 = shalt.err (!%p4821_p0)
}
0x22d0   : > { %4698 = dma.vmem_to_hbm [thread:$0]  (%p5034_p5), %s5882_s28, 16, %s5880_s0, %s3858_s25  }
0x22d1 PF: > { %s6007_s2 = sld [smem:[#allocation7_spill]]  ;;  %s6008_s1 = sld [smem:[#allocation5_spill]] }
0x22d7   : > { %p4704_p1 = scmp.ge.s32.totalorder %s6007_s2, 2  ;;  %s3882_s22 = sand.u32 1, %s6008_s1  }
0x22d8   : > { %s3883_s26 = scalar_lea.sflag [#allocation3], %s3882_s22 }
0x22d9   : > { %p4701_p2 = pnand %p4704_p1, %p5038_p6 }
0x22db   : > { %4842 = dma.done.wait (!%p4701_p2), %s3883_s26, 16  }
0x22dc   : > { %4844 = vsyncadd (!%p4701_p2), %s3883_s26, 4294967280  ;;  %s6010_s25 = sld [smem:[#allocation8_spill]]  ;;  %s6011_s6 = sld [smem:[#allocation6_spill]] }
0x22dd   : > { %s6012_s24 = sld [smem:[#allocation9_spill]]  ;;  %s6013_s4 = smov %s4851_s30 }
0x22e2   : > { %p33_p3 = scmp.ge.s32.totalorder %s6010_s25, 4   ;;  %s6014_s30 = smov %s6011_s6 }
0x22e4   :  { %35 = sbr.rel (!%p33_p3) target bundleno = 14 (0xe), region = 159 }
0x22eb   :  { %3887 = vsyncpa [#allocation3], 1 }
0x22ec   :  { %3889 = vsyncpa [#allocation3 + $0x1], 1 }

</bundles_post_ra>
